<compile_context>
chip_gen: v7x
topology: tpu7x:2x2x1
jax: 0.10.0
libtpu: 0.0.40
codegen_flags: <defaults>
</compile_context>

<pallas_src>
import math

import jax
import jax.numpy as jnp
from jax.experimental import pallas as pl
from jax.experimental.pallas import tpu as pltpu

LANE = 128


def _round_up(n, m):
    return ((n + m - 1) // m) * m


def lstm_classifier_kernel(ids_ref, emb_hbm, wih_ref, whh_ref, b_ref,
                           h0_ref, c0_ref, wout_ref, bout_ref, out_ref,
                           embeds_ref, hs_ref, sem):
    """Fused embedding gather + LSTM recurrence + output projection (one sequence).

    ids_ref    : (L,)        i32  SMEM   token ids
    emb_hbm    : (V, E)      f32  HBM    embedding table (rows DMA-gathered)
    wih_ref    : (E, 4*Hp)   bf16 VMEM   W_ih^T, each gate block padded to Hp lanes
    whh_ref    : (Hp, 4*Hp)  bf16 VMEM   W_hh^T, rows/cols zero-padded
    b_ref      : (1, 4*Hp)   f32  VMEM   b_ih + b_hh, gate blocks padded
    h0_ref     : (1, Hp)     f32  VMEM   zero-padded initial hidden state
    c0_ref     : (1, Hp)     f32  VMEM   zero-padded initial cell state
    wout_ref   : (Hp, Cp)    bf16 VMEM   W_out^T zero-padded to a lane-dense width
    bout_ref   : (1, Cp)     f32  VMEM
    out_ref    : (L, Cp)     f32  VMEM   per-timestep logits (padded lanes stay zero)
    embeds_ref : (L, E)      f32  VMEM scratch: gathered embedding rows
    hs_ref     : (L, Hp)     f32  VMEM scratch: per-step hidden states (lane-dense)
    sem        : (L,)        DMA semaphores for the gather
    """
    L = out_ref.shape[0]
    Hp = h0_ref.shape[-1]

    # ---- Fused embedding gather: all L row DMAs in flight at once, then wait. ----
    def row_copy(t):
        return pltpu.make_async_copy(
            emb_hbm.at[pl.ds(ids_ref[t], 1), :],
            embeds_ref.at[pl.ds(t, 1), :],
            sem.at[t])

    for t in range(L):
        row_copy(t).start()
    for t in range(L):
        row_copy(t).wait()

    # ---- Hoisted input projection: one MXU op + bias, off the serial path. ----
    gx = jnp.dot(embeds_ref[...].astype(jnp.bfloat16), wih_ref[...],
                 preferred_element_type=jnp.float32) + b_ref[...]          # (L, 4*Hp) f32

    whh = whh_ref[...]                                                      # (Hp, 4*Hp) bf16

    # ---- Recurrence: fully unrolled static loop (L is small & static). ----
    # TODO(synk): hold W_hh resident in the MXU across steps via pltpu.matmul_push_rhs /
    #   matmul_acc_lhs / matmul_pop (MRF pop on v5e/v6e, addressable MRB on v7x); kept
    #   as jnp.dot for portability.
    # TODO(synk): for long sequences switch to lax.fori_loop(..., unroll=8) to cap code
    #   size / vreg pressure instead of full unrolling.
    h = h0_ref[...]                                                         # (1, Hp) f32
    c = c0_ref[...]
    for t in range(L):
        gates = gx[t:t + 1, :] + jnp.dot(h.astype(jnp.bfloat16), whh,
                                         preferred_element_type=jnp.float32)   # (1, 4*Hp)
        # Full-width activations (2 EUP invocations), then vreg-aligned 128-lane slices.
        sig = jax.nn.sigmoid(gates)
        tnh = jnp.tanh(gates)
        # PyTorch gate order: i, f, g, o; each gate owns a full Hp=128-lane slab.
        i_g = sig[:, 0 * Hp:1 * Hp]
        f_g = sig[:, 1 * Hp:2 * Hp]
        g_g = tnh[:, 2 * Hp:3 * Hp]
        o_g = sig[:, 3 * Hp:4 * Hp]
        c = f_g * c + i_g * g_g
        h = o_g * jnp.tanh(c)
        hs_ref[pl.ds(t, 1), :] = h                       # unmasked, lane-dense 128-lane store

    # ---- Single batched, lane-dense output projection + one unmasked store. ----
    out_ref[...] = jnp.dot(hs_ref[...].astype(jnp.bfloat16), wout_ref[...],
                           preferred_element_type=jnp.float32) + bout_ref[...]


def prepare_params(raw):
    """One-time preprocessing (hoisted off the per-call path): fuse biases, scatter each
    gate block into a full 128-lane slab, pad the output head lane-dense, cast the MXU
    weight operands to bf16."""
    E = raw["w_ih_t"].shape[0]
    H = raw["w_hh_t"].shape[0]
    C = raw["b_out"].shape[0]
    Hp = _round_up(H, LANE)
    Cp = _round_up(C, LANE)

    w_ih = jnp.zeros((E, 4 * Hp), jnp.float32)
    w_hh = jnp.zeros((Hp, 4 * Hp), jnp.float32)
    b_g = jnp.zeros((1, 4 * Hp), jnp.float32)
    b_raw = raw["b_ih"] + raw["b_hh"]
    for k in range(4):   # PyTorch gate order i, f, g, o
        w_ih = w_ih.at[:, k * Hp:k * Hp + H].set(raw["w_ih_t"][:, k * H:(k + 1) * H])
        w_hh = w_hh.at[:H, k * Hp:k * Hp + H].set(raw["w_hh_t"][:, k * H:(k + 1) * H])
        b_g = b_g.at[:, k * Hp:k * Hp + H].set(b_raw[None, k * H:(k + 1) * H])
    w_out = jnp.zeros((Hp, Cp), jnp.float32).at[:H, :C].set(raw["w_out_t"])
    b_out = jnp.zeros((1, Cp), jnp.float32).at[:, :C].set(raw["b_out"][None, :])

    return {
        "embedding": raw["embedding"],          # (V, E) f32, stays in HBM; rows DMA-gathered
        "w_ih_t": w_ih.astype(jnp.bfloat16),
        "w_hh_t": w_hh.astype(jnp.bfloat16),
        "b_gates": b_g,
        "w_out_t": w_out.astype(jnp.bfloat16),
        "b_out": b_out,
        "hidden_dim": H,
        "hidden_pad": Hp,
        "num_classes": C,
        "classes_pad": Cp,
    }


def lstm_classifier_forward(x, h, c, kp):
    """Mirrors LSTMClassifier.forward(x, h, c) -> logits of shape (len(x), num_classes)."""
    L = x.shape[0]
    E = kp["embedding"].shape[-1]
    H, Hp = kp["hidden_dim"], kp["hidden_pad"]
    C, Cp = kp["num_classes"], kp["classes_pad"]

    # Only per-call prep: zero-pad the (1, H) states to the lane-dense width.
    h_pad = jnp.zeros((1, Hp), jnp.float32).at[:, :H].set(h)
    c_pad = jnp.zeros((1, Hp), jnp.float32).at[:, :H].set(c)

    vmem = pl.BlockSpec(memory_space=pltpu.MemorySpace.VMEM)
    smem = pl.BlockSpec(memory_space=pltpu.MemorySpace.SMEM)
    hbm = pl.BlockSpec(memory_space=pl.ANY)

    # TODO(synk): to batch multiple sequences, add a leading "parallel" grid axis over
    #   sequences (also engages the second TensorCore on v7x); the module's forward is
    #   single-sequence so none is added here.
    # TODO(synk): at large H/L, tile the input/output projections with pltpu.emit_pipeline
    #   and set pltpu.CompilerParams(vmem_limit_bytes=...) -- at H=32/L=8 everything fits
    #   VMEM-resident with large margin.
    out = pl.pallas_call(
        lstm_classifier_kernel,
        out_shape=jax.ShapeDtypeStruct((L, Cp), jnp.float32),
        in_specs=[smem, hbm, vmem, vmem, vmem, vmem, vmem, vmem, vmem],
        out_specs=vmem,
        scratch_shapes=[
            pltpu.VMEM((L, E), jnp.float32),    # gathered embedding rows
            pltpu.VMEM((L, Hp), jnp.float32),   # per-step hidden states (lane-dense)
            pltpu.SemaphoreType.DMA((L,)),      # one semaphore per gathered row
        ],
    )(x, kp["embedding"], kp["w_ih_t"], kp["w_hh_t"], kp["b_gates"],
      h_pad, c_pad, kp["w_out_t"], kp["b_out"])
    return out[:, :C]


def _reference_forward(x, h, c, raw):
    """Pure-JAX reference with PyTorch LSTM semantics.  Matmul operands are cast to bf16
    (f32 accumulation) to mirror the kernel's deliberate MXU precision choice."""
    H = h.shape[-1]
    emb = jnp.take(raw["embedding"], x, axis=0)
    wih = raw["w_ih_t"].astype(jnp.bfloat16)
    whh = raw["w_hh_t"].astype(jnp.bfloat16)
    b = (raw["b_ih"] + raw["b_hh"]).reshape(1, -1)
    gx = jnp.dot(emb.astype(jnp.bfloat16), wih, preferred_element_type=jnp.float32) + b

    def step(carry, gx_t):
        h, c = carry
        gates = gx_t[None, :] + jnp.dot(h.astype(jnp.bfloat16), whh,
                                        preferred_element_type=jnp.float32)
        i_g = jax.nn.sigmoid(gates[:, 0 * H:1 * H])
        f_g = jax.nn.sigmoid(gates[:, 1 * H:2 * H])
        g_g = jnp.tanh(gates[:, 2 * H:3 * H])
        o_g = jax.nn.sigmoid(gates[:, 3 * H:4 * H])
        c_new = f_g * c + i_g * g_g
        h_new = o_g * jnp.tanh(c_new)
        return (h_new, c_new), h_new[0]

    (_, _), hs = jax.lax.scan(step, (h, c), gx)
    return (jnp.dot(hs.astype(jnp.bfloat16), raw["w_out_t"].astype(jnp.bfloat16),
                    preferred_element_type=jnp.float32) + raw["b_out"][None, :])


def init_params(key, vocab_size, embedding_dim, hidden_dim, num_classes):
    ks = jax.random.split(key, 7)
    s = 1.0 / math.sqrt(hidden_dim)
    return {
        "embedding": jax.random.normal(ks[0], (vocab_size, embedding_dim), jnp.float32),
        "w_ih_t": jax.random.uniform(ks[1], (embedding_dim, 4 * hidden_dim), jnp.float32, -s, s),
        "w_hh_t": jax.random.uniform(ks[2], (hidden_dim, 4 * hidden_dim), jnp.float32, -s, s),
        "b_ih": jax.random.uniform(ks[3], (4 * hidden_dim,), jnp.float32, -s, s),
        "b_hh": jax.random.uniform(ks[4], (4 * hidden_dim,), jnp.float32, -s, s),
        "w_out_t": jax.random.uniform(ks[5], (hidden_dim, num_classes), jnp.float32, -s, s),
        "b_out": jax.random.uniform(ks[6], (num_classes,), jnp.float32, -s, s),
    }


if __name__ == "__main__":
    VOCAB, EMBED, HIDDEN, NUM_CLASSES, SEQ_LEN = 100, 32, 32, 4, 8

    key = jax.random.PRNGKey(0)
    k_params, k_tokens = jax.random.split(key)
    raw_params = init_params(k_params, VOCAB, EMBED, HIDDEN, NUM_CLASSES)
    kernel_params = prepare_params(raw_params)   # one-time prep, hoisted off the forward path

    x = jax.random.randint(k_tokens, (SEQ_LEN,), 0, VOCAB, dtype=jnp.int32)
    h0 = jnp.zeros((1, HIDDEN), jnp.float32)
    c0 = jnp.zeros((1, HIDDEN), jnp.float32)

    out = lstm_classifier_forward(x, h0, c0, kernel_params)
    out = jax.block_until_ready(out)

    ref = jax.block_until_ready(_reference_forward(x, h0, c0, raw_params))
    assert out.shape == (SEQ_LEN, NUM_CLASSES)
    assert jnp.allclose(out, ref, rtol=2e-3, atol=2e-3), "mismatch vs reference"

    print("KERNEL_OK")
</pallas_src>

<mosaic_0001>
module attributes {stable_mosaic.version = 11 : i64} {
  func.func @lstm_classifier_kernel(%arg0: memref<8xi32, #tpu.memory_space<smem>>, %arg1: memref<100x32xf32, #tpu.memory_space<any>>, %arg2: memref<32x512xbf16, #tpu.memory_space<vmem>>, %arg3: memref<128x512xbf16, #tpu.memory_space<vmem>>, %arg4: memref<1x512xf32, #tpu.memory_space<vmem>>, %arg5: memref<1x128xf32, #tpu.memory_space<vmem>>, %arg6: memref<1x128xf32, #tpu.memory_space<vmem>>, %arg7: memref<128x128xbf16, #tpu.memory_space<vmem>>, %arg8: memref<1x128xf32, #tpu.memory_space<vmem>>, %arg9: memref<8x128xf32, #tpu.memory_space<vmem>>, %arg10: memref<8x32xf32, #tpu.memory_space<vmem>>, %arg11: memref<8x128xf32, #tpu.memory_space<vmem>>, %arg12: memref<8x!tpu.dma_semaphore, #tpu.memory_space<semaphore_mem>>) attributes {dimension_semantics = [], scalar_prefetch = 0 : i64, scratch_operands = 3 : i64, tpu.core_type = #tpu.core_type<tc>} {
    %c0 = arith.constant 0 : index
    %0 = memref.load %arg0[%c0] : memref<8xi32, #tpu.memory_space<smem>>
    %c0_i32 = arith.constant 0 : i32
    %c0_i32_0 = arith.constant 0 : i32
    %1 = tpu.memref_slice %arg1[%0, %c0_i32_0] : memref<100x32xf32, #tpu.memory_space<any>> -> memref<1x32xf32, #tpu.memory_space<any>>
    %c0_i32_1 = arith.constant 0 : i32
    %c0_i32_2 = arith.constant 0 : i32
    %2 = tpu.memref_slice %arg10[%c0_i32_1, %c0_i32_2] : memref<8x32xf32, #tpu.memory_space<vmem>> -> memref<1x32xf32, #tpu.memory_space<vmem>>
    %3 = tpu.memref_slice %arg12[%c0_i32] : memref<8x!tpu.dma_semaphore, #tpu.memory_space<semaphore_mem>> -> memref<1x!tpu.dma_semaphore, #tpu.memory_space<semaphore_mem>>
    %4 = tpu.memref_squeeze %3 : memref<1x!tpu.dma_semaphore, #tpu.memory_space<semaphore_mem>> -> memref<!tpu.dma_semaphore, #tpu.memory_space<semaphore_mem>>
    tpu.enqueue_dma source(%1 : memref<1x32xf32, #tpu.memory_space<any>>) target(%2 : memref<1x32xf32, #tpu.memory_space<vmem>>) target_semaphore(%4 : memref<!tpu.dma_semaphore, #tpu.memory_space<semaphore_mem>>)
    %c1 = arith.constant 1 : index
    %5 = memref.load %arg0[%c1] : memref<8xi32, #tpu.memory_space<smem>>
    %c1_i32 = arith.constant 1 : i32
    %c0_i32_3 = arith.constant 0 : i32
    %6 = tpu.memref_slice %arg1[%5, %c0_i32_3] : memref<100x32xf32, #tpu.memory_space<any>> -> memref<1x32xf32, #tpu.memory_space<any>>
    %c1_i32_4 = arith.constant 1 : i32
    %c0_i32_5 = arith.constant 0 : i32
    %7 = tpu.memref_slice %arg10[%c1_i32_4, %c0_i32_5] : memref<8x32xf32, #tpu.memory_space<vmem>> -> memref<1x32xf32, #tpu.memory_space<vmem>>
    %8 = tpu.memref_slice %arg12[%c1_i32] : memref<8x!tpu.dma_semaphore, #tpu.memory_space<semaphore_mem>> -> memref<1x!tpu.dma_semaphore, #tpu.memory_space<semaphore_mem>>
    %9 = tpu.memref_squeeze %8 : memref<1x!tpu.dma_semaphore, #tpu.memory_space<semaphore_mem>> -> memref<!tpu.dma_semaphore, #tpu.memory_space<semaphore_mem>>
    tpu.enqueue_dma source(%6 : memref<1x32xf32, #tpu.memory_space<any>>) target(%7 : memref<1x32xf32, #tpu.memory_space<vmem>>) target_semaphore(%9 : memref<!tpu.dma_semaphore, #tpu.memory_space<semaphore_mem>>)
    %c2 = arith.constant 2 : index
    %10 = memref.load %arg0[%c2] : memref<8xi32, #tpu.memory_space<smem>>
    %c2_i32 = arith.constant 2 : i32
    %c0_i32_6 = arith.constant 0 : i32
    %11 = tpu.memref_slice %arg1[%10, %c0_i32_6] : memref<100x32xf32, #tpu.memory_space<any>> -> memref<1x32xf32, #tpu.memory_space<any>>
    %c2_i32_7 = arith.constant 2 : i32
    %c0_i32_8 = arith.constant 0 : i32
    %12 = tpu.memref_slice %arg10[%c2_i32_7, %c0_i32_8] : memref<8x32xf32, #tpu.memory_space<vmem>> -> memref<1x32xf32, #tpu.memory_space<vmem>>
    %13 = tpu.memref_slice %arg12[%c2_i32] : memref<8x!tpu.dma_semaphore, #tpu.memory_space<semaphore_mem>> -> memref<1x!tpu.dma_semaphore, #tpu.memory_space<semaphore_mem>>
    %14 = tpu.memref_squeeze %13 : memref<1x!tpu.dma_semaphore, #tpu.memory_space<semaphore_mem>> -> memref<!tpu.dma_semaphore, #tpu.memory_space<semaphore_mem>>
    tpu.enqueue_dma source(%11 : memref<1x32xf32, #tpu.memory_space<any>>) target(%12 : memref<1x32xf32, #tpu.memory_space<vmem>>) target_semaphore(%14 : memref<!tpu.dma_semaphore, #tpu.memory_space<semaphore_mem>>)
    %c3 = arith.constant 3 : index
    %15 = memref.load %arg0[%c3] : memref<8xi32, #tpu.memory_space<smem>>
    %c3_i32 = arith.constant 3 : i32
    %c0_i32_9 = arith.constant 0 : i32
    %16 = tpu.memref_slice %arg1[%15, %c0_i32_9] : memref<100x32xf32, #tpu.memory_space<any>> -> memref<1x32xf32, #tpu.memory_space<any>>
    %c3_i32_10 = arith.constant 3 : i32
    %c0_i32_11 = arith.constant 0 : i32
    %17 = tpu.memref_slice %arg10[%c3_i32_10, %c0_i32_11] : memref<8x32xf32, #tpu.memory_space<vmem>> -> memref<1x32xf32, #tpu.memory_space<vmem>>
    %18 = tpu.memref_slice %arg12[%c3_i32] : memref<8x!tpu.dma_semaphore, #tpu.memory_space<semaphore_mem>> -> memref<1x!tpu.dma_semaphore, #tpu.memory_space<semaphore_mem>>
    %19 = tpu.memref_squeeze %18 : memref<1x!tpu.dma_semaphore, #tpu.memory_space<semaphore_mem>> -> memref<!tpu.dma_semaphore, #tpu.memory_space<semaphore_mem>>
    tpu.enqueue_dma source(%16 : memref<1x32xf32, #tpu.memory_space<any>>) target(%17 : memref<1x32xf32, #tpu.memory_space<vmem>>) target_semaphore(%19 : memref<!tpu.dma_semaphore, #tpu.memory_space<semaphore_mem>>)
    %c4 = arith.constant 4 : index
    %20 = memref.load %arg0[%c4] : memref<8xi32, #tpu.memory_space<smem>>
    %c4_i32 = arith.constant 4 : i32
    %c0_i32_12 = arith.constant 0 : i32
    %21 = tpu.memref_slice %arg1[%20, %c0_i32_12] : memref<100x32xf32, #tpu.memory_space<any>> -> memref<1x32xf32, #tpu.memory_space<any>>
    %c4_i32_13 = arith.constant 4 : i32
    %c0_i32_14 = arith.constant 0 : i32
    %22 = tpu.memref_slice %arg10[%c4_i32_13, %c0_i32_14] : memref<8x32xf32, #tpu.memory_space<vmem>> -> memref<1x32xf32, #tpu.memory_space<vmem>>
    %23 = tpu.memref_slice %arg12[%c4_i32] : memref<8x!tpu.dma_semaphore, #tpu.memory_space<semaphore_mem>> -> memref<1x!tpu.dma_semaphore, #tpu.memory_space<semaphore_mem>>
    %24 = tpu.memref_squeeze %23 : memref<1x!tpu.dma_semaphore, #tpu.memory_space<semaphore_mem>> -> memref<!tpu.dma_semaphore, #tpu.memory_space<semaphore_mem>>
    tpu.enqueue_dma source(%21 : memref<1x32xf32, #tpu.memory_space<any>>) target(%22 : memref<1x32xf32, #tpu.memory_space<vmem>>) target_semaphore(%24 : memref<!tpu.dma_semaphore, #tpu.memory_space<semaphore_mem>>)
    %c5 = arith.constant 5 : index
    %25 = memref.load %arg0[%c5] : memref<8xi32, #tpu.memory_space<smem>>
    %c5_i32 = arith.constant 5 : i32
    %c0_i32_15 = arith.constant 0 : i32
    %26 = tpu.memref_slice %arg1[%25, %c0_i32_15] : memref<100x32xf32, #tpu.memory_space<any>> -> memref<1x32xf32, #tpu.memory_space<any>>
    %c5_i32_16 = arith.constant 5 : i32
    %c0_i32_17 = arith.constant 0 : i32
    %27 = tpu.memref_slice %arg10[%c5_i32_16, %c0_i32_17] : memref<8x32xf32, #tpu.memory_space<vmem>> -> memref<1x32xf32, #tpu.memory_space<vmem>>
    %28 = tpu.memref_slice %arg12[%c5_i32] : memref<8x!tpu.dma_semaphore, #tpu.memory_space<semaphore_mem>> -> memref<1x!tpu.dma_semaphore, #tpu.memory_space<semaphore_mem>>
    %29 = tpu.memref_squeeze %28 : memref<1x!tpu.dma_semaphore, #tpu.memory_space<semaphore_mem>> -> memref<!tpu.dma_semaphore, #tpu.memory_space<semaphore_mem>>
    tpu.enqueue_dma source(%26 : memref<1x32xf32, #tpu.memory_space<any>>) target(%27 : memref<1x32xf32, #tpu.memory_space<vmem>>) target_semaphore(%29 : memref<!tpu.dma_semaphore, #tpu.memory_space<semaphore_mem>>)
    %c6 = arith.constant 6 : index
    %30 = memref.load %arg0[%c6] : memref<8xi32, #tpu.memory_space<smem>>
    %c6_i32 = arith.constant 6 : i32
    %c0_i32_18 = arith.constant 0 : i32
    %31 = tpu.memref_slice %arg1[%30, %c0_i32_18] : memref<100x32xf32, #tpu.memory_space<any>> -> memref<1x32xf32, #tpu.memory_space<any>>
    %c6_i32_19 = arith.constant 6 : i32
    %c0_i32_20 = arith.constant 0 : i32
    %32 = tpu.memref_slice %arg10[%c6_i32_19, %c0_i32_20] : memref<8x32xf32, #tpu.memory_space<vmem>> -> memref<1x32xf32, #tpu.memory_space<vmem>>
    %33 = tpu.memref_slice %arg12[%c6_i32] : memref<8x!tpu.dma_semaphore, #tpu.memory_space<semaphore_mem>> -> memref<1x!tpu.dma_semaphore, #tpu.memory_space<semaphore_mem>>
    %34 = tpu.memref_squeeze %33 : memref<1x!tpu.dma_semaphore, #tpu.memory_space<semaphore_mem>> -> memref<!tpu.dma_semaphore, #tpu.memory_space<semaphore_mem>>
    tpu.enqueue_dma source(%31 : memref<1x32xf32, #tpu.memory_space<any>>) target(%32 : memref<1x32xf32, #tpu.memory_space<vmem>>) target_semaphore(%34 : memref<!tpu.dma_semaphore, #tpu.memory_space<semaphore_mem>>)
    %c7 = arith.constant 7 : index
    %35 = memref.load %arg0[%c7] : memref<8xi32, #tpu.memory_space<smem>>
    %c7_i32 = arith.constant 7 : i32
    %c0_i32_21 = arith.constant 0 : i32
    %36 = tpu.memref_slice %arg1[%35, %c0_i32_21] : memref<100x32xf32, #tpu.memory_space<any>> -> memref<1x32xf32, #tpu.memory_space<any>>
    %c7_i32_22 = arith.constant 7 : i32
    %c0_i32_23 = arith.constant 0 : i32
    %37 = tpu.memref_slice %arg10[%c7_i32_22, %c0_i32_23] : memref<8x32xf32, #tpu.memory_space<vmem>> -> memref<1x32xf32, #tpu.memory_space<vmem>>
    %38 = tpu.memref_slice %arg12[%c7_i32] : memref<8x!tpu.dma_semaphore, #tpu.memory_space<semaphore_mem>> -> memref<1x!tpu.dma_semaphore, #tpu.memory_space<semaphore_mem>>
    %39 = tpu.memref_squeeze %38 : memref<1x!tpu.dma_semaphore, #tpu.memory_space<semaphore_mem>> -> memref<!tpu.dma_semaphore, #tpu.memory_space<semaphore_mem>>
    tpu.enqueue_dma source(%36 : memref<1x32xf32, #tpu.memory_space<any>>) target(%37 : memref<1x32xf32, #tpu.memory_space<vmem>>) target_semaphore(%39 : memref<!tpu.dma_semaphore, #tpu.memory_space<semaphore_mem>>)
    %c0_24 = arith.constant 0 : index
    %40 = memref.load %arg0[%c0_24] : memref<8xi32, #tpu.memory_space<smem>>
    %c0_i32_25 = arith.constant 0 : i32
    %c0_i32_26 = arith.constant 0 : i32
    %41 = tpu.memref_slice %arg1[%40, %c0_i32_26] : memref<100x32xf32, #tpu.memory_space<any>> -> memref<1x32xf32, #tpu.memory_space<any>>
    %c0_i32_27 = arith.constant 0 : i32
    %c0_i32_28 = arith.constant 0 : i32
    %42 = tpu.memref_slice %arg10[%c0_i32_27, %c0_i32_28] : memref<8x32xf32, #tpu.memory_space<vmem>> -> memref<1x32xf32, #tpu.memory_space<vmem>>
    %43 = tpu.memref_slice %arg12[%c0_i32_25] : memref<8x!tpu.dma_semaphore, #tpu.memory_space<semaphore_mem>> -> memref<1x!tpu.dma_semaphore, #tpu.memory_space<semaphore_mem>>
    %44 = tpu.memref_squeeze %43 : memref<1x!tpu.dma_semaphore, #tpu.memory_space<semaphore_mem>> -> memref<!tpu.dma_semaphore, #tpu.memory_space<semaphore_mem>>
    tpu.wait_dma2 semaphore(%44 : memref<!tpu.dma_semaphore, #tpu.memory_space<semaphore_mem>>) src(%41 : memref<1x32xf32, #tpu.memory_space<any>>) dst(%42 : memref<1x32xf32, #tpu.memory_space<vmem>>)
    %c1_29 = arith.constant 1 : index
    %45 = memref.load %arg0[%c1_29] : memref<8xi32, #tpu.memory_space<smem>>
    %c1_i32_30 = arith.constant 1 : i32
    %c0_i32_31 = arith.constant 0 : i32
    %46 = tpu.memref_slice %arg1[%45, %c0_i32_31] : memref<100x32xf32, #tpu.memory_space<any>> -> memref<1x32xf32, #tpu.memory_space<any>>
    %c1_i32_32 = arith.constant 1 : i32
    %c0_i32_33 = arith.constant 0 : i32
    %47 = tpu.memref_slice %arg10[%c1_i32_32, %c0_i32_33] : memref<8x32xf32, #tpu.memory_space<vmem>> -> memref<1x32xf32, #tpu.memory_space<vmem>>
    %48 = tpu.memref_slice %arg12[%c1_i32_30] : memref<8x!tpu.dma_semaphore, #tpu.memory_space<semaphore_mem>> -> memref<1x!tpu.dma_semaphore, #tpu.memory_space<semaphore_mem>>
    %49 = tpu.memref_squeeze %48 : memref<1x!tpu.dma_semaphore, #tpu.memory_space<semaphore_mem>> -> memref<!tpu.dma_semaphore, #tpu.memory_space<semaphore_mem>>
    tpu.wait_dma2 semaphore(%49 : memref<!tpu.dma_semaphore, #tpu.memory_space<semaphore_mem>>) src(%46 : memref<1x32xf32, #tpu.memory_space<any>>) dst(%47 : memref<1x32xf32, #tpu.memory_space<vmem>>)
    %c2_34 = arith.constant 2 : index
    %50 = memref.load %arg0[%c2_34] : memref<8xi32, #tpu.memory_space<smem>>
    %c2_i32_35 = arith.constant 2 : i32
    %c0_i32_36 = arith.constant 0 : i32
    %51 = tpu.memref_slice %arg1[%50, %c0_i32_36] : memref<100x32xf32, #tpu.memory_space<any>> -> memref<1x32xf32, #tpu.memory_space<any>>
    %c2_i32_37 = arith.constant 2 : i32
    %c0_i32_38 = arith.constant 0 : i32
    %52 = tpu.memref_slice %arg10[%c2_i32_37, %c0_i32_38] : memref<8x32xf32, #tpu.memory_space<vmem>> -> memref<1x32xf32, #tpu.memory_space<vmem>>
    %53 = tpu.memref_slice %arg12[%c2_i32_35] : memref<8x!tpu.dma_semaphore, #tpu.memory_space<semaphore_mem>> -> memref<1x!tpu.dma_semaphore, #tpu.memory_space<semaphore_mem>>
    %54 = tpu.memref_squeeze %53 : memref<1x!tpu.dma_semaphore, #tpu.memory_space<semaphore_mem>> -> memref<!tpu.dma_semaphore, #tpu.memory_space<semaphore_mem>>
    tpu.wait_dma2 semaphore(%54 : memref<!tpu.dma_semaphore, #tpu.memory_space<semaphore_mem>>) src(%51 : memref<1x32xf32, #tpu.memory_space<any>>) dst(%52 : memref<1x32xf32, #tpu.memory_space<vmem>>)
    %c3_39 = arith.constant 3 : index
    %55 = memref.load %arg0[%c3_39] : memref<8xi32, #tpu.memory_space<smem>>
    %c3_i32_40 = arith.constant 3 : i32
    %c0_i32_41 = arith.constant 0 : i32
    %56 = tpu.memref_slice %arg1[%55, %c0_i32_41] : memref<100x32xf32, #tpu.memory_space<any>> -> memref<1x32xf32, #tpu.memory_space<any>>
    %c3_i32_42 = arith.constant 3 : i32
    %c0_i32_43 = arith.constant 0 : i32
    %57 = tpu.memref_slice %arg10[%c3_i32_42, %c0_i32_43] : memref<8x32xf32, #tpu.memory_space<vmem>> -> memref<1x32xf32, #tpu.memory_space<vmem>>
    %58 = tpu.memref_slice %arg12[%c3_i32_40] : memref<8x!tpu.dma_semaphore, #tpu.memory_space<semaphore_mem>> -> memref<1x!tpu.dma_semaphore, #tpu.memory_space<semaphore_mem>>
    %59 = tpu.memref_squeeze %58 : memref<1x!tpu.dma_semaphore, #tpu.memory_space<semaphore_mem>> -> memref<!tpu.dma_semaphore, #tpu.memory_space<semaphore_mem>>
    tpu.wait_dma2 semaphore(%59 : memref<!tpu.dma_semaphore, #tpu.memory_space<semaphore_mem>>) src(%56 : memref<1x32xf32, #tpu.memory_space<any>>) dst(%57 : memref<1x32xf32, #tpu.memory_space<vmem>>)
    %c4_44 = arith.constant 4 : index
    %60 = memref.load %arg0[%c4_44] : memref<8xi32, #tpu.memory_space<smem>>
    %c4_i32_45 = arith.constant 4 : i32
    %c0_i32_46 = arith.constant 0 : i32
    %61 = tpu.memref_slice %arg1[%60, %c0_i32_46] : memref<100x32xf32, #tpu.memory_space<any>> -> memref<1x32xf32, #tpu.memory_space<any>>
    %c4_i32_47 = arith.constant 4 : i32
    %c0_i32_48 = arith.constant 0 : i32
    %62 = tpu.memref_slice %arg10[%c4_i32_47, %c0_i32_48] : memref<8x32xf32, #tpu.memory_space<vmem>> -> memref<1x32xf32, #tpu.memory_space<vmem>>
    %63 = tpu.memref_slice %arg12[%c4_i32_45] : memref<8x!tpu.dma_semaphore, #tpu.memory_space<semaphore_mem>> -> memref<1x!tpu.dma_semaphore, #tpu.memory_space<semaphore_mem>>
    %64 = tpu.memref_squeeze %63 : memref<1x!tpu.dma_semaphore, #tpu.memory_space<semaphore_mem>> -> memref<!tpu.dma_semaphore, #tpu.memory_space<semaphore_mem>>
    tpu.wait_dma2 semaphore(%64 : memref<!tpu.dma_semaphore, #tpu.memory_space<semaphore_mem>>) src(%61 : memref<1x32xf32, #tpu.memory_space<any>>) dst(%62 : memref<1x32xf32, #tpu.memory_space<vmem>>)
    %c5_49 = arith.constant 5 : index
    %65 = memref.load %arg0[%c5_49] : memref<8xi32, #tpu.memory_space<smem>>
    %c5_i32_50 = arith.constant 5 : i32
    %c0_i32_51 = arith.constant 0 : i32
    %66 = tpu.memref_slice %arg1[%65, %c0_i32_51] : memref<100x32xf32, #tpu.memory_space<any>> -> memref<1x32xf32, #tpu.memory_space<any>>
    %c5_i32_52 = arith.constant 5 : i32
    %c0_i32_53 = arith.constant 0 : i32
    %67 = tpu.memref_slice %arg10[%c5_i32_52, %c0_i32_53] : memref<8x32xf32, #tpu.memory_space<vmem>> -> memref<1x32xf32, #tpu.memory_space<vmem>>
    %68 = tpu.memref_slice %arg12[%c5_i32_50] : memref<8x!tpu.dma_semaphore, #tpu.memory_space<semaphore_mem>> -> memref<1x!tpu.dma_semaphore, #tpu.memory_space<semaphore_mem>>
    %69 = tpu.memref_squeeze %68 : memref<1x!tpu.dma_semaphore, #tpu.memory_space<semaphore_mem>> -> memref<!tpu.dma_semaphore, #tpu.memory_space<semaphore_mem>>
    tpu.wait_dma2 semaphore(%69 : memref<!tpu.dma_semaphore, #tpu.memory_space<semaphore_mem>>) src(%66 : memref<1x32xf32, #tpu.memory_space<any>>) dst(%67 : memref<1x32xf32, #tpu.memory_space<vmem>>)
    %c6_54 = arith.constant 6 : index
    %70 = memref.load %arg0[%c6_54] : memref<8xi32, #tpu.memory_space<smem>>
    %c6_i32_55 = arith.constant 6 : i32
    %c0_i32_56 = arith.constant 0 : i32
    %71 = tpu.memref_slice %arg1[%70, %c0_i32_56] : memref<100x32xf32, #tpu.memory_space<any>> -> memref<1x32xf32, #tpu.memory_space<any>>
    %c6_i32_57 = arith.constant 6 : i32
    %c0_i32_58 = arith.constant 0 : i32
    %72 = tpu.memref_slice %arg10[%c6_i32_57, %c0_i32_58] : memref<8x32xf32, #tpu.memory_space<vmem>> -> memref<1x32xf32, #tpu.memory_space<vmem>>
    %73 = tpu.memref_slice %arg12[%c6_i32_55] : memref<8x!tpu.dma_semaphore, #tpu.memory_space<semaphore_mem>> -> memref<1x!tpu.dma_semaphore, #tpu.memory_space<semaphore_mem>>
    %74 = tpu.memref_squeeze %73 : memref<1x!tpu.dma_semaphore, #tpu.memory_space<semaphore_mem>> -> memref<!tpu.dma_semaphore, #tpu.memory_space<semaphore_mem>>
    tpu.wait_dma2 semaphore(%74 : memref<!tpu.dma_semaphore, #tpu.memory_space<semaphore_mem>>) src(%71 : memref<1x32xf32, #tpu.memory_space<any>>) dst(%72 : memref<1x32xf32, #tpu.memory_space<vmem>>)
    %c7_59 = arith.constant 7 : index
    %75 = memref.load %arg0[%c7_59] : memref<8xi32, #tpu.memory_space<smem>>
    %c7_i32_60 = arith.constant 7 : i32
    %c0_i32_61 = arith.constant 0 : i32
    %76 = tpu.memref_slice %arg1[%75, %c0_i32_61] : memref<100x32xf32, #tpu.memory_space<any>> -> memref<1x32xf32, #tpu.memory_space<any>>
    %c7_i32_62 = arith.constant 7 : i32
    %c0_i32_63 = arith.constant 0 : i32
    %77 = tpu.memref_slice %arg10[%c7_i32_62, %c0_i32_63] : memref<8x32xf32, #tpu.memory_space<vmem>> -> memref<1x32xf32, #tpu.memory_space<vmem>>
    %78 = tpu.memref_slice %arg12[%c7_i32_60] : memref<8x!tpu.dma_semaphore, #tpu.memory_space<semaphore_mem>> -> memref<1x!tpu.dma_semaphore, #tpu.memory_space<semaphore_mem>>
    %79 = tpu.memref_squeeze %78 : memref<1x!tpu.dma_semaphore, #tpu.memory_space<semaphore_mem>> -> memref<!tpu.dma_semaphore, #tpu.memory_space<semaphore_mem>>
    tpu.wait_dma2 semaphore(%79 : memref<!tpu.dma_semaphore, #tpu.memory_space<semaphore_mem>>) src(%76 : memref<1x32xf32, #tpu.memory_space<any>>) dst(%77 : memref<1x32xf32, #tpu.memory_space<vmem>>)
    %c0_64 = arith.constant 0 : index
    %c0_65 = arith.constant 0 : index
    %80 = vector.load %arg10[%c0_64, %c0_65] : memref<8x32xf32, #tpu.memory_space<vmem>>, vector<8x32xf32>
    %81 = arith.truncf %80 : vector<8x32xf32> to vector<8x32xbf16>
    %c0_66 = arith.constant 0 : index
    %c0_67 = arith.constant 0 : index
    %82 = vector.load %arg2[%c0_66, %c0_67] : memref<32x512xbf16, #tpu.memory_space<vmem>>, vector<32x512xbf16>
    %cst = arith.constant dense<0.000000e+00> : vector<8x512xf32>
    %83 = tpu.matmul %81, %82, %cst {dimension_numbers = #tpu.dot_dimension_numbers<[1], [0], [0], [1], [0, 0, 1, 1], [], []>} : vector<8x32xbf16>, vector<32x512xbf16>, vector<8x512xf32> -> vector<8x512xf32>
    %c0_68 = arith.constant 0 : index
    %c0_69 = arith.constant 0 : index
    %84 = vector.load %arg4[%c0_68, %c0_69] : memref<1x512xf32, #tpu.memory_space<vmem>>, vector<1x512xf32>
    %85 = vector.broadcast %84 : vector<1x512xf32> to vector<8x512xf32>
    %86 = arith.addf %83, %85 : vector<8x512xf32>
    %c0_70 = arith.constant 0 : index
    %c0_71 = arith.constant 0 : index
    %87 = vector.load %arg3[%c0_70, %c0_71] : memref<128x512xbf16, #tpu.memory_space<vmem>>, vector<128x512xbf16>
    %c0_72 = arith.constant 0 : index
    %c0_73 = arith.constant 0 : index
    %88 = vector.load %arg5[%c0_72, %c0_73] : memref<1x128xf32, #tpu.memory_space<vmem>>, vector<1x128xf32>
    %c0_74 = arith.constant 0 : index
    %c0_75 = arith.constant 0 : index
    %89 = vector.load %arg6[%c0_74, %c0_75] : memref<1x128xf32, #tpu.memory_space<vmem>>, vector<1x128xf32>
    %90 = vector.extract_strided_slice %86 {offsets = [0, 0], sizes = [1, 512], strides = [1, 1]} : vector<8x512xf32> to vector<1x512xf32>
    %91 = arith.truncf %88 : vector<1x128xf32> to vector<1x128xbf16>
    %cst_76 = arith.constant dense<0.000000e+00> : vector<1x512xf32>
    %92 = tpu.matmul %91, %87, %cst_76 {dimension_numbers = #tpu.dot_dimension_numbers<[1], [0], [0], [1], [0, 0, 1, 1], [], []>} : vector<1x128xbf16>, vector<128x512xbf16>, vector<1x512xf32> -> vector<1x512xf32>
    %93 = arith.addf %90, %92 : vector<1x512xf32>
    %94 = arith.negf %93 : vector<1x512xf32>
    %95 = math.exp %94 : vector<1x512xf32>
    %cst_77 = arith.constant 1.000000e+00 : f32
    %96 = vector.broadcast %cst_77 : f32 to vector<1x512xf32>
    %97 = arith.addf %96, %95 : vector<1x512xf32>
    %98 = arith.divf %96, %97 : vector<1x512xf32>
    %99 = math.tanh %93 : vector<1x512xf32>
    %100 = vector.extract_strided_slice %98 {offsets = [0, 0], sizes = [1, 128], strides = [1, 1]} : vector<1x512xf32> to vector<1x128xf32>
    %101 = vector.extract_strided_slice %98 {offsets = [0, 128], sizes = [1, 128], strides = [1, 1]} : vector<1x512xf32> to vector<1x128xf32>
    %102 = vector.extract_strided_slice %99 {offsets = [0, 256], sizes = [1, 128], strides = [1, 1]} : vector<1x512xf32> to vector<1x128xf32>
    %103 = vector.extract_strided_slice %98 {offsets = [0, 384], sizes = [1, 128], strides = [1, 1]} : vector<1x512xf32> to vector<1x128xf32>
    %104 = arith.mulf %101, %89 : vector<1x128xf32>
    %105 = arith.mulf %100, %102 : vector<1x128xf32>
    %106 = arith.addf %104, %105 : vector<1x128xf32>
    %107 = math.tanh %106 : vector<1x128xf32>
    %108 = arith.mulf %103, %107 : vector<1x128xf32>
    %c0_78 = arith.constant 0 : index
    %c0_79 = arith.constant 0 : index
    %109 = vector.load %arg11[%c0_78, %c0_79] : memref<8x128xf32, #tpu.memory_space<vmem>>, vector<1x128xf32>
    tpu.vector_store %arg11[%c0_78, %c0_79], %108 {strides = array<i32>} : memref<8x128xf32, #tpu.memory_space<vmem>>, vector<1x128xf32>,
    %110 = vector.extract_strided_slice %86 {offsets = [1, 0], sizes = [1, 512], strides = [1, 1]} : vector<8x512xf32> to vector<1x512xf32>
    %111 = arith.truncf %108 : vector<1x128xf32> to vector<1x128xbf16>
    %cst_80 = arith.constant dense<0.000000e+00> : vector<1x512xf32>
    %112 = tpu.matmul %111, %87, %cst_80 {dimension_numbers = #tpu.dot_dimension_numbers<[1], [0], [0], [1], [0, 0, 1, 1], [], []>} : vector<1x128xbf16>, vector<128x512xbf16>, vector<1x512xf32> -> vector<1x512xf32>
    %113 = arith.addf %110, %112 : vector<1x512xf32>
    %114 = arith.negf %113 : vector<1x512xf32>
    %115 = math.exp %114 : vector<1x512xf32>
    %cst_81 = arith.constant 1.000000e+00 : f32
    %116 = vector.broadcast %cst_81 : f32 to vector<1x512xf32>
    %117 = arith.addf %116, %115 : vector<1x512xf32>
    %118 = arith.divf %116, %117 : vector<1x512xf32>
    %119 = math.tanh %113 : vector<1x512xf32>
    %120 = vector.extract_strided_slice %118 {offsets = [0, 0], sizes = [1, 128], strides = [1, 1]} : vector<1x512xf32> to vector<1x128xf32>
    %121 = vector.extract_strided_slice %118 {offsets = [0, 128], sizes = [1, 128], strides = [1, 1]} : vector<1x512xf32> to vector<1x128xf32>
    %122 = vector.extract_strided_slice %119 {offsets = [0, 256], sizes = [1, 128], strides = [1, 1]} : vector<1x512xf32> to vector<1x128xf32>
    %123 = vector.extract_strided_slice %118 {offsets = [0, 384], sizes = [1, 128], strides = [1, 1]} : vector<1x512xf32> to vector<1x128xf32>
    %124 = arith.mulf %121, %106 : vector<1x128xf32>
    %125 = arith.mulf %120, %122 : vector<1x128xf32>
    %126 = arith.addf %124, %125 : vector<1x128xf32>
    %127 = math.tanh %126 : vector<1x128xf32>
    %128 = arith.mulf %123, %127 : vector<1x128xf32>
    %c1_82 = arith.constant 1 : index
    %c0_83 = arith.constant 0 : index
    %129 = vector.load %arg11[%c1_82, %c0_83] : memref<8x128xf32, #tpu.memory_space<vmem>>, vector<1x128xf32>
    tpu.vector_store %arg11[%c1_82, %c0_83], %128 {strides = array<i32>} : memref<8x128xf32, #tpu.memory_space<vmem>>, vector<1x128xf32>,
    %130 = vector.extract_strided_slice %86 {offsets = [2, 0], sizes = [1, 512], strides = [1, 1]} : vector<8x512xf32> to vector<1x512xf32>
    %131 = arith.truncf %128 : vector<1x128xf32> to vector<1x128xbf16>
    %cst_84 = arith.constant dense<0.000000e+00> : vector<1x512xf32>
    %132 = tpu.matmul %131, %87, %cst_84 {dimension_numbers = #tpu.dot_dimension_numbers<[1], [0], [0], [1], [0, 0, 1, 1], [], []>} : vector<1x128xbf16>, vector<128x512xbf16>, vector<1x512xf32> -> vector<1x512xf32>
    %133 = arith.addf %130, %132 : vector<1x512xf32>
    %134 = arith.negf %133 : vector<1x512xf32>
    %135 = math.exp %134 : vector<1x512xf32>
    %cst_85 = arith.constant 1.000000e+00 : f32
    %136 = vector.broadcast %cst_85 : f32 to vector<1x512xf32>
    %137 = arith.addf %136, %135 : vector<1x512xf32>
    %138 = arith.divf %136, %137 : vector<1x512xf32>
    %139 = math.tanh %133 : vector<1x512xf32>
    %140 = vector.extract_strided_slice %138 {offsets = [0, 0], sizes = [1, 128], strides = [1, 1]} : vector<1x512xf32> to vector<1x128xf32>
    %141 = vector.extract_strided_slice %138 {offsets = [0, 128], sizes = [1, 128], strides = [1, 1]} : vector<1x512xf32> to vector<1x128xf32>
    %142 = vector.extract_strided_slice %139 {offsets = [0, 256], sizes = [1, 128], strides = [1, 1]} : vector<1x512xf32> to vector<1x128xf32>
    %143 = vector.extract_strided_slice %138 {offsets = [0, 384], sizes = [1, 128], strides = [1, 1]} : vector<1x512xf32> to vector<1x128xf32>
    %144 = arith.mulf %141, %126 : vector<1x128xf32>
    %145 = arith.mulf %140, %142 : vector<1x128xf32>
    %146 = arith.addf %144, %145 : vector<1x128xf32>
    %147 = math.tanh %146 : vector<1x128xf32>
    %148 = arith.mulf %143, %147 : vector<1x128xf32>
    %c2_86 = arith.constant 2 : index
    %c0_87 = arith.constant 0 : index
    %149 = vector.load %arg11[%c2_86, %c0_87] : memref<8x128xf32, #tpu.memory_space<vmem>>, vector<1x128xf32>
    tpu.vector_store %arg11[%c2_86, %c0_87], %148 {strides = array<i32>} : memref<8x128xf32, #tpu.memory_space<vmem>>, vector<1x128xf32>,
    %150 = vector.extract_strided_slice %86 {offsets = [3, 0], sizes = [1, 512], strides = [1, 1]} : vector<8x512xf32> to vector<1x512xf32>
    %151 = arith.truncf %148 : vector<1x128xf32> to vector<1x128xbf16>
    %cst_88 = arith.constant dense<0.000000e+00> : vector<1x512xf32>
    %152 = tpu.matmul %151, %87, %cst_88 {dimension_numbers = #tpu.dot_dimension_numbers<[1], [0], [0], [1], [0, 0, 1, 1], [], []>} : vector<1x128xbf16>, vector<128x512xbf16>, vector<1x512xf32> -> vector<1x512xf32>
    %153 = arith.addf %150, %152 : vector<1x512xf32>
    %154 = arith.negf %153 : vector<1x512xf32>
    %155 = math.exp %154 : vector<1x512xf32>
    %cst_89 = arith.constant 1.000000e+00 : f32
    %156 = vector.broadcast %cst_89 : f32 to vector<1x512xf32>
    %157 = arith.addf %156, %155 : vector<1x512xf32>
    %158 = arith.divf %156, %157 : vector<1x512xf32>
    %159 = math.tanh %153 : vector<1x512xf32>
    %160 = vector.extract_strided_slice %158 {offsets = [0, 0], sizes = [1, 128], strides = [1, 1]} : vector<1x512xf32> to vector<1x128xf32>
    %161 = vector.extract_strided_slice %158 {offsets = [0, 128], sizes = [1, 128], strides = [1, 1]} : vector<1x512xf32> to vector<1x128xf32>
    %162 = vector.extract_strided_slice %159 {offsets = [0, 256], sizes = [1, 128], strides = [1, 1]} : vector<1x512xf32> to vector<1x128xf32>
    %163 = vector.extract_strided_slice %158 {offsets = [0, 384], sizes = [1, 128], strides = [1, 1]} : vector<1x512xf32> to vector<1x128xf32>
    %164 = arith.mulf %161, %146 : vector<1x128xf32>
    %165 = arith.mulf %160, %162 : vector<1x128xf32>
    %166 = arith.addf %164, %165 : vector<1x128xf32>
    %167 = math.tanh %166 : vector<1x128xf32>
    %168 = arith.mulf %163, %167 : vector<1x128xf32>
    %c3_90 = arith.constant 3 : index
    %c0_91 = arith.constant 0 : index
    %169 = vector.load %arg11[%c3_90, %c0_91] : memref<8x128xf32, #tpu.memory_space<vmem>>, vector<1x128xf32>
    tpu.vector_store %arg11[%c3_90, %c0_91], %168 {strides = array<i32>} : memref<8x128xf32, #tpu.memory_space<vmem>>, vector<1x128xf32>,
    %170 = vector.extract_strided_slice %86 {offsets = [4, 0], sizes = [1, 512], strides = [1, 1]} : vector<8x512xf32> to vector<1x512xf32>
    %171 = arith.truncf %168 : vector<1x128xf32> to vector<1x128xbf16>
    %cst_92 = arith.constant dense<0.000000e+00> : vector<1x512xf32>
    %172 = tpu.matmul %171, %87, %cst_92 {dimension_numbers = #tpu.dot_dimension_numbers<[1], [0], [0], [1], [0, 0, 1, 1], [], []>} : vector<1x128xbf16>, vector<128x512xbf16>, vector<1x512xf32> -> vector<1x512xf32>
    %173 = arith.addf %170, %172 : vector<1x512xf32>
    %174 = arith.negf %173 : vector<1x512xf32>
    %175 = math.exp %174 : vector<1x512xf32>
    %cst_93 = arith.constant 1.000000e+00 : f32
    %176 = vector.broadcast %cst_93 : f32 to vector<1x512xf32>
    %177 = arith.addf %176, %175 : vector<1x512xf32>
    %178 = arith.divf %176, %177 : vector<1x512xf32>
    %179 = math.tanh %173 : vector<1x512xf32>
    %180 = vector.extract_strided_slice %178 {offsets = [0, 0], sizes = [1, 128], strides = [1, 1]} : vector<1x512xf32> to vector<1x128xf32>
    %181 = vector.extract_strided_slice %178 {offsets = [0, 128], sizes = [1, 128], strides = [1, 1]} : vector<1x512xf32> to vector<1x128xf32>
    %182 = vector.extract_strided_slice %179 {offsets = [0, 256], sizes = [1, 128], strides = [1, 1]} : vector<1x512xf32> to vector<1x128xf32>
    %183 = vector.extract_strided_slice %178 {offsets = [0, 384], sizes = [1, 128], strides = [1, 1]} : vector<1x512xf32> to vector<1x128xf32>
    %184 = arith.mulf %181, %166 : vector<1x128xf32>
    %185 = arith.mulf %180, %182 : vector<1x128xf32>
    %186 = arith.addf %184, %185 : vector<1x128xf32>
    %187 = math.tanh %186 : vector<1x128xf32>
    %188 = arith.mulf %183, %187 : vector<1x128xf32>
    %c4_94 = arith.constant 4 : index
    %c0_95 = arith.constant 0 : index
    %189 = vector.load %arg11[%c4_94, %c0_95] : memref<8x128xf32, #tpu.memory_space<vmem>>, vector<1x128xf32>
    tpu.vector_store %arg11[%c4_94, %c0_95], %188 {strides = array<i32>} : memref<8x128xf32, #tpu.memory_space<vmem>>, vector<1x128xf32>,
    %190 = vector.extract_strided_slice %86 {offsets = [5, 0], sizes = [1, 512], strides = [1, 1]} : vector<8x512xf32> to vector<1x512xf32>
    %191 = arith.truncf %188 : vector<1x128xf32> to vector<1x128xbf16>
    %cst_96 = arith.constant dense<0.000000e+00> : vector<1x512xf32>
    %192 = tpu.matmul %191, %87, %cst_96 {dimension_numbers = #tpu.dot_dimension_numbers<[1], [0], [0], [1], [0, 0, 1, 1], [], []>} : vector<1x128xbf16>, vector<128x512xbf16>, vector<1x512xf32> -> vector<1x512xf32>
    %193 = arith.addf %190, %192 : vector<1x512xf32>
    %194 = arith.negf %193 : vector<1x512xf32>
    %195 = math.exp %194 : vector<1x512xf32>
    %cst_97 = arith.constant 1.000000e+00 : f32
    %196 = vector.broadcast %cst_97 : f32 to vector<1x512xf32>
    %197 = arith.addf %196, %195 : vector<1x512xf32>
    %198 = arith.divf %196, %197 : vector<1x512xf32>
    %199 = math.tanh %193 : vector<1x512xf32>
    %200 = vector.extract_strided_slice %198 {offsets = [0, 0], sizes = [1, 128], strides = [1, 1]} : vector<1x512xf32> to vector<1x128xf32>
    %201 = vector.extract_strided_slice %198 {offsets = [0, 128], sizes = [1, 128], strides = [1, 1]} : vector<1x512xf32> to vector<1x128xf32>
    %202 = vector.extract_strided_slice %199 {offsets = [0, 256], sizes = [1, 128], strides = [1, 1]} : vector<1x512xf32> to vector<1x128xf32>
    %203 = vector.extract_strided_slice %198 {offsets = [0, 384], sizes = [1, 128], strides = [1, 1]} : vector<1x512xf32> to vector<1x128xf32>
    %204 = arith.mulf %201, %186 : vector<1x128xf32>
    %205 = arith.mulf %200, %202 : vector<1x128xf32>
    %206 = arith.addf %204, %205 : vector<1x128xf32>
    %207 = math.tanh %206 : vector<1x128xf32>
    %208 = arith.mulf %203, %207 : vector<1x128xf32>
    %c5_98 = arith.constant 5 : index
    %c0_99 = arith.constant 0 : index
    %209 = vector.load %arg11[%c5_98, %c0_99] : memref<8x128xf32, #tpu.memory_space<vmem>>, vector<1x128xf32>
    tpu.vector_store %arg11[%c5_98, %c0_99], %208 {strides = array<i32>} : memref<8x128xf32, #tpu.memory_space<vmem>>, vector<1x128xf32>,
    %210 = vector.extract_strided_slice %86 {offsets = [6, 0], sizes = [1, 512], strides = [1, 1]} : vector<8x512xf32> to vector<1x512xf32>
    %211 = arith.truncf %208 : vector<1x128xf32> to vector<1x128xbf16>
    %cst_100 = arith.constant dense<0.000000e+00> : vector<1x512xf32>
    %212 = tpu.matmul %211, %87, %cst_100 {dimension_numbers = #tpu.dot_dimension_numbers<[1], [0], [0], [1], [0, 0, 1, 1], [], []>} : vector<1x128xbf16>, vector<128x512xbf16>, vector<1x512xf32> -> vector<1x512xf32>
    %213 = arith.addf %210, %212 : vector<1x512xf32>
    %214 = arith.negf %213 : vector<1x512xf32>
    %215 = math.exp %214 : vector<1x512xf32>
    %cst_101 = arith.constant 1.000000e+00 : f32
    %216 = vector.broadcast %cst_101 : f32 to vector<1x512xf32>
    %217 = arith.addf %216, %215 : vector<1x512xf32>
    %218 = arith.divf %216, %217 : vector<1x512xf32>
    %219 = math.tanh %213 : vector<1x512xf32>
    %220 = vector.extract_strided_slice %218 {offsets = [0, 0], sizes = [1, 128], strides = [1, 1]} : vector<1x512xf32> to vector<1x128xf32>
    %221 = vector.extract_strided_slice %218 {offsets = [0, 128], sizes = [1, 128], strides = [1, 1]} : vector<1x512xf32> to vector<1x128xf32>
    %222 = vector.extract_strided_slice %219 {offsets = [0, 256], sizes = [1, 128], strides = [1, 1]} : vector<1x512xf32> to vector<1x128xf32>
    %223 = vector.extract_strided_slice %218 {offsets = [0, 384], sizes = [1, 128], strides = [1, 1]} : vector<1x512xf32> to vector<1x128xf32>
    %224 = arith.mulf %221, %206 : vector<1x128xf32>
    %225 = arith.mulf %220, %222 : vector<1x128xf32>
    %226 = arith.addf %224, %225 : vector<1x128xf32>
    %227 = math.tanh %226 : vector<1x128xf32>
    %228 = arith.mulf %223, %227 : vector<1x128xf32>
    %c6_102 = arith.constant 6 : index
    %c0_103 = arith.constant 0 : index
    %229 = vector.load %arg11[%c6_102, %c0_103] : memref<8x128xf32, #tpu.memory_space<vmem>>, vector<1x128xf32>
    tpu.vector_store %arg11[%c6_102, %c0_103], %228 {strides = array<i32>} : memref<8x128xf32, #tpu.memory_space<vmem>>, vector<1x128xf32>,
    %230 = vector.extract_strided_slice %86 {offsets = [7, 0], sizes = [1, 512], strides = [1, 1]} : vector<8x512xf32> to vector<1x512xf32>
    %231 = arith.truncf %228 : vector<1x128xf32> to vector<1x128xbf16>
    %cst_104 = arith.constant dense<0.000000e+00> : vector<1x512xf32>
    %232 = tpu.matmul %231, %87, %cst_104 {dimension_numbers = #tpu.dot_dimension_numbers<[1], [0], [0], [1], [0, 0, 1, 1], [], []>} : vector<1x128xbf16>, vector<128x512xbf16>, vector<1x512xf32> -> vector<1x512xf32>
    %233 = arith.addf %230, %232 : vector<1x512xf32>
    %234 = arith.negf %233 : vector<1x512xf32>
    %235 = math.exp %234 : vector<1x512xf32>
    %cst_105 = arith.constant 1.000000e+00 : f32
    %236 = vector.broadcast %cst_105 : f32 to vector<1x512xf32>
    %237 = arith.addf %236, %235 : vector<1x512xf32>
    %238 = arith.divf %236, %237 : vector<1x512xf32>
    %239 = math.tanh %233 : vector<1x512xf32>
    %240 = vector.extract_strided_slice %238 {offsets = [0, 0], sizes = [1, 128], strides = [1, 1]} : vector<1x512xf32> to vector<1x128xf32>
    %241 = vector.extract_strided_slice %238 {offsets = [0, 128], sizes = [1, 128], strides = [1, 1]} : vector<1x512xf32> to vector<1x128xf32>
    %242 = vector.extract_strided_slice %239 {offsets = [0, 256], sizes = [1, 128], strides = [1, 1]} : vector<1x512xf32> to vector<1x128xf32>
    %243 = vector.extract_strided_slice %238 {offsets = [0, 384], sizes = [1, 128], strides = [1, 1]} : vector<1x512xf32> to vector<1x128xf32>
    %244 = arith.mulf %241, %226 : vector<1x128xf32>
    %245 = arith.mulf %240, %242 : vector<1x128xf32>
    %246 = arith.addf %244, %245 : vector<1x128xf32>
    %247 = math.tanh %246 : vector<1x128xf32>
    %248 = arith.mulf %243, %247 : vector<1x128xf32>
    %c7_106 = arith.constant 7 : index
    %c0_107 = arith.constant 0 : index
    %249 = vector.load %arg11[%c7_106, %c0_107] : memref<8x128xf32, #tpu.memory_space<vmem>>, vector<1x128xf32>
    tpu.vector_store %arg11[%c7_106, %c0_107], %248 {strides = array<i32>} : memref<8x128xf32, #tpu.memory_space<vmem>>, vector<1x128xf32>,
    %c0_108 = arith.constant 0 : index
    %c0_109 = arith.constant 0 : index
    %250 = vector.load %arg11[%c0_108, %c0_109] : memref<8x128xf32, #tpu.memory_space<vmem>>, vector<8x128xf32>
    %251 = arith.truncf %250 : vector<8x128xf32> to vector<8x128xbf16>
    %c0_110 = arith.constant 0 : index
    %c0_111 = arith.constant 0 : index
    %252 = vector.load %arg7[%c0_110, %c0_111] : memref<128x128xbf16, #tpu.memory_space<vmem>>, vector<128x128xbf16>
    %cst_112 = arith.constant dense<0.000000e+00> : vector<8x128xf32>
    %253 = tpu.matmul %251, %252, %cst_112 {dimension_numbers = #tpu.dot_dimension_numbers<[1], [0], [0], [1], [0, 0, 1, 1], [], []>} : vector<8x128xbf16>, vector<128x128xbf16>, vector<8x128xf32> -> vector<8x128xf32>
    %c0_113 = arith.constant 0 : index
    %c0_114 = arith.constant 0 : index
    %254 = vector.load %arg8[%c0_113, %c0_114] : memref<1x128xf32, #tpu.memory_space<vmem>>, vector<1x128xf32>
    %255 = vector.broadcast %254 : vector<1x128xf32> to vector<8x128xf32>
    %256 = arith.addf %253, %255 : vector<8x128xf32>
    %c0_115 = arith.constant 0 : index
    %c0_116 = arith.constant 0 : index
    %257 = vector.load %arg9[%c0_115, %c0_116] : memref<8x128xf32, #tpu.memory_space<vmem>>, vector<8x128xf32>
    tpu.vector_store %arg9[%c0_115, %c0_116], %256 {strides = array<i32>} : memref<8x128xf32, #tpu.memory_space<vmem>>, vector<8x128xf32>,
    return
  }
}

</mosaic_0001>

<bundles_post_ra>
// kernel: tpu_custom_call.1
= control target key start
LH: loop header
LB: loop body
LE: loop exit
PB: predicated region body
PF: predicated region fallthrough
CT: control target
= control target key end

     0   :  { %14 = vsyncpa [#allocation8], 0  ;;  %s3142_s0 = inlined_call_operand.vmem [shape: s32[8], index: 0, kind: input, shape index: {}]   ;;  %s3143_s1 = inlined_call_operand.vmem [shape: f32[100,32], index: 1, kind: input, shape index: {}]   ;;  %s3144_s2 = inlined_call_operand.vmem [shape: bf16[32,512], index: 2, kind: input, shape index: {}]   ;;  %s3145_s3 = inlined_call_operand.hbm [shape: bf16[128,512], index: 3, kind: input, shape index: {}]   ;;  %s3146_s4 = inlined_call_operand.vmem [shape: f32[1,512], index: 4, kind: input, shape index: {}]   ;;  %s3147_s5 = inlined_call_operand.vmem [shape: f32[1,128], index: 5, kind: input, shape index: {}]   ;;  %s3148_s6 = inlined_call_operand.vmem [shape: f32[1,128], index: 6, kind: input, shape index: {}]   ;;  %s3149_s7 = inlined_call_operand.vmem [shape: bf16[128,128], index: 7, kind: input, shape index: {}]   ;;  %s3150_s8 = inlined_call_operand.vmem [shape: f32[1,128], index: 8, kind: input, shape index: {}]   ;;  %s3151_s9 = inlined_call_operand.hbm [shape: f32[8,128], index: 9, kind: output, shape index: {}]  }
   0x1   :  { %15 = vsyncpa [#allocation6], 0 }
   0x2   :  { %16 = vsyncpa [#allocation7], 0  ;;  %s23_s11 = sshll.u32 %s3142_s0, 4  ;;  %s24_s11 = int_to_ptr.vmem [resolvable:$true] %s23_s11 }
   0x3   :  { %s2477_s12 = scalar_lea.vmem %s24_s11, 16  ;;  %p2482_p1 = scmp.lt.s32.totalorder %s24_s11, %s24_s11 }
   0x4   :  { %p2478_p0 = scmp.ne.s32.totalorder %s24_s11, %s2477_s12  ;;  %p2483_p2 = scmp.lt.s32.totalorder %s2477_s12, %s2477_s12 }
   0x6   :  { %p2484_p3 = por %p2483_p2, %p2482_p1 }
   0x8   :  { %p2485_p4 = pnand %p2484_p3, %p2478_p0 }
   0xa   :  { %2488 = shalt.err (!%p2485_p4)
}
   0xb   :  { %s2555_s13 = smov [#allocation5]   ;;  %s2556_s14 = smov [#allocation9]  }
   0xc   :  { %26 = dma.vmem_to_smem %s24_s11, 16, %s2555_s13, [#allocation8]  }
   0xd   :  { %s34_s15 = sshll.u32 %s2556_s14, 4  ;;  %s2489_s18 = scalar_lea.hbm %s3145_s3, 4096  ;;  %s35_s15 = int_to_ptr.vmem [resolvable:$true] %s34_s15 }
   0xe   :  { %p2490_p5 = scmp.ne.s32.totalorder %s3145_s3, %s2489_s18  ;;  %p2493_p6 = scmp.lt.u32.totalorder %s2489_s18, %s3145_s3 }
  0x10   :  { %p2495_p7 = pnand %p2493_p6, %p2490_p5 }
  0x12   :  { %2498 = shalt.err (!%p2495_p7)
}
  0x13   :  { %s2499_s22 = scalar_lea.vmem %s35_s15, 4096  ;;  %p2504_p9 = scmp.lt.s32.totalorder %s35_s15, %s35_s15 }
  0x14   :  { %p2500_p8 = scmp.ne.s32.totalorder %s35_s15, %s2499_s22  ;;  %p2505_p10 = scmp.lt.s32.totalorder %s2499_s22, %s2499_s22 }
  0x16   :  { %p2506_p11 = por %p2505_p10, %p2504_p9 }
  0x18   :  { %p2507_p12 = pnand %p2506_p11, %p2500_p8 }
  0x1a   :  { %2510 = shalt.err (!%p2507_p12)
}
  0x1b   :  { %s2557_s23 = smov 256   ;;  %s2558_s24 = smov 16  }
  0x1c   :  { %40 = dma.hbm_to_vmem [thread:$0]  %s3145_s3, 4096, %s35_s15, [#allocation6], %s2557_s23, %s2557_s23, %s2558_s24  }
  0x1d   :  { %2533 = dma.done.wait [#allocation8], 16  }
  0x1e   :  { %2534 = vsyncadd [#allocation8], 4294967280 }
  0x1f   :  { %2535 = dma.done.wait [#allocation6], 4096  }
  0x20   :  { %2536 = vsyncadd [#allocation6], 4294963200 }
  0x21   :  { %57 = sfence }
  0x22   :  { %s59_s27 = sld [smem:[#allocation5]] }
  0x28   :  { %s60_s30 = scalar_lea.vmem %s3143_s1, %s59_s27 }
  0x29   :  { %v78_v0 = vld [vmem:[%s60_s30] sm:$0x1] }
  0x2a   :  { %79 = vst [vmem:[#allocation2] sm:$0x1] %v78_v0 }
  0x2b   :  { %104 = vsyncadd [#allocation4], 16  ;;  %s2122_s10 = sld [smem:[#allocation5 + $0x1]] }
  0x31   :  { %s106_s13 = scalar_lea.vmem %s3143_s1, %s2122_s10 }
  0x32   :  { %v126_v1 = vld [vmem:[%s106_s13] sm:$0x1] }
  0x33   :  { %127 = vst [vmem:[#allocation2 + $0x1] sm:$0x1] %v126_v1 }
  0x34   :  { %152 = vsyncadd [#allocation4 + $0x1], 16  ;;  %s2123_s3 = sld [smem:[#allocation5 + $0x2]] }
  0x3a   :  { %s154_s16 = scalar_lea.vmem %s3143_s1, %s2123_s3 }
  0x3b   :  { %v174_v2 = vld [vmem:[%s154_s16] sm:$0x1] }
  0x3c   :  { %175 = vst [vmem:[#allocation2 + $0x2] sm:$0x1] %v174_v2 }
  0x3d   :  { %200 = vsyncadd [#allocation4 + $0x2], 16  ;;  %s2124_s17 = sld [smem:[#allocation5 + $0x3]] }
  0x43   :  { %s202_s20 = scalar_lea.vmem %s3143_s1, %s2124_s17 }
  0x44   :  { %v222_v3 = vld [vmem:[%s202_s20] sm:$0x1] }
  0x45   :  { %223 = vst [vmem:[#allocation2 + $0x3] sm:$0x1] %v222_v3 }
  0x46   :  { %248 = vsyncadd [#allocation4 + $0x3], 16  ;;  %s2125_s0 = sld [smem:[#allocation5 + $0x4]] }
  0x4c   :  { %s250_s23 = scalar_lea.vmem %s3143_s1, %s2125_s0 }
  0x4d   :  { %v270_v4 = vld [vmem:[%s250_s23] sm:$0x1] }
  0x4e   :  { %271 = vst [vmem:[#allocation2 + $0x4] sm:$0x1] %v270_v4 }
  0x4f   :  { %296 = vsyncadd [#allocation4 + $0x4], 16  ;;  %s2126_s24 = sld [smem:[#allocation5 + $0x5]] }
  0x55   :  { %s298_s27 = scalar_lea.vmem %s3143_s1, %s2126_s24 }
  0x56   :  { %v318_v5 = vld [vmem:[%s298_s27] sm:$0x1] }
  0x57   :  { %319 = vst [vmem:[#allocation2 + $0x5] sm:$0x1] %v318_v5 }
  0x58   :  { %344 = vsyncadd [#allocation4 + $0x5], 16  ;;  %s2127_s28 = sld [smem:[#allocation5 + $0x6]] }
  0x5e   :  { %s346_s10 = scalar_lea.vmem %s3143_s1, %s2127_s28 }
  0x5f   :  { %v366_v6 = vld [vmem:[%s346_s10] sm:$0x1] }
  0x60   :  { %367 = vst [vmem:[#allocation2 + $0x6] sm:$0x1] %v366_v6 }
  0x61   :  { %392 = vsyncadd [#allocation4 + $0x6], 16  ;;  %s2128_s11 = sld [smem:[#allocation5 + $0x7]] }
  0x67   :  { %s394_s3 = scalar_lea.vmem %s3143_s1, %s2128_s11 }
  0x68   :  { %v414_v7 = vld [vmem:[%s394_s3] sm:$0x1] }
  0x69   :  { %415 = vst [vmem:[#allocation2 + $0x7] sm:$0x1] %v414_v7 }
  0x6a   :  { %440 = vsyncadd [#allocation4 + $0x7], 16 }
  0x6b   :  { %2537 = dma.done.wait [#allocation4], 16 }
  0x6c   :  { %2538 = vsyncadd [#allocation4], 4294967280 }
  0x6d   :  { %2539 = dma.done.wait [#allocation4 + $0x1], 16 }
  0x6e   :  { %2540 = vsyncadd [#allocation4 + $0x1], 4294967280 }
  0x6f   :  { %2541 = dma.done.wait [#allocation4 + $0x2], 16 }
  0x70   :  { %2542 = vsyncadd [#allocation4 + $0x2], 4294967280 }
  0x71   :  { %2543 = dma.done.wait [#allocation4 + $0x3], 16 }
  0x72   :  { %2544 = vsyncadd [#allocation4 + $0x3], 4294967280 }
  0x73   :  { %2545 = dma.done.wait [#allocation4 + $0x4], 16 }
  0x74   :  { %2546 = vsyncadd [#allocation4 + $0x4], 4294967280 }
  0x75   :  { %2547 = dma.done.wait [#allocation4 + $0x5], 16 }
  0x76   :  { %2548 = vsyncadd [#allocation4 + $0x5], 4294967280 }
  0x77   :  { %2549 = dma.done.wait [#allocation4 + $0x6], 16 }
  0x78   :  { %2550 = vsyncadd [#allocation4 + $0x6], 4294967280 }
  0x79   :  { %2551 = dma.done.wait [#allocation4 + $0x7], 16 }
  0x7a   :  { %2552 = vsyncadd [#allocation4 + $0x7], 4294967280  ;;  %v2559_v8 = vmov 0   ;;  %v2249_v9 = vld [vmem:[%s3144_s2 + $0x4] ss:$16 sps:$4 sm:$0xff]   ;;  %vm538_vm0 = vcmask 261120   ;;  %v478_v57 = vlaneseq }
  0x7b   :  { %574 = vmatprep.mubr.bf16.mxu1 %v2559_v8  ;;  %851 = vmatprep.mubr.bf16.mxu0 %v2559_v8  ;;  %v2657_v10 = vld [vmem:[#allocation9 + $0x4] ss:$16 sps:$4 sm:$0xff]   ;;  %v2253_v11 = vld [vmem:[%s3144_s2] ss:$16 sps:$4 sm:$0xff]   ;;  %v2261_v18 = vld [vmem:[%s3144_s2 + $0x8] ss:$16 sps:$4 sm:$0xff]  }
  0x7c   :  { %542 = vmatprep.subr.bf16.mxu1 %v2249_v9  ;;  %v2662_v12 = vld [vmem:[#allocation9] ss:$16 sps:$4 sm:$0xff]   ;;  %819 = vmatprep.subr.bf16.mxu0 %v2657_v10  ;;  %v2255_v13 = vld [vmem:[%s3144_s2 + $0x24] ss:$16 sps:$4 sm:$0xff]   ;;  %v2263_v19 = vld [vmem:[%s3144_s2 + $0xc] ss:$16 sps:$4 sm:$0xff]  }
  0x7d   :  { %543 = vmatpush1.bf16.msra.mxu1 %v2253_v11  ;;  %820 = vmatpush1.bf16.msra.mxu0 %v2662_v12  ;;  %v2669_v14 = vld [vmem:[#allocation9 + $0x24] ss:$16 sps:$4 sm:$0xff]   ;;  %v2259_v15 = vld [vmem:[%s3144_s2 + $0x20] ss:$16 sps:$4 sm:$0xff]   ;;  %v2269_v23 = vld [vmem:[%s3144_s2 + $0x2c] ss:$16 sps:$4 sm:$0xff]  }
  0x7e   :  { %544 = vmatprep.subr.bf16.mxu1 %v2255_v13  ;;  %v2674_v16 = vld [vmem:[#allocation9 + $0x20] ss:$16 sps:$4 sm:$0xff]   ;;  %821 = vmatprep.subr.bf16.mxu0 %v2669_v14  ;;  %v2683_v21 = vld [vmem:[#allocation9 + $0x44] ss:$16 sps:$4 sm:$0xff]   ;;  %v2267_v25 = vld [vmem:[%s3144_s2 + $0x28] ss:$16 sps:$4 sm:$0xff]  }
  0x7f   :  { %v466_v17 = vld [vmem:[#allocation2] sm:$0xff]  ;;  %v2704_v28 = vld [vmem:[#allocation9 + $0xc] ss:$16 sps:$4 sm:$0xff]   ;;  %v2709_v30 = vld [vmem:[#allocation9 + $0x8] ss:$16 sps:$4 sm:$0xff]   ;;  %v479_v61 = vshrl.u32 %v478_v57, 7 }
  0x80   :  { %v467_v20 = vpack.c.bf16 %v466_v17, %v466_v17  ;;  %v2686_v22 = vld [vmem:[#allocation9 + $0x40] ss:$16 sps:$4 sm:$0xff]   ;;  %v2692_v24 = vld [vmem:[#allocation9 + $0x64] ss:$16 sps:$4 sm:$0xff]   ;;  %v2716_v32 = vld [vmem:[#allocation9 + $0x2c] ss:$16 sps:$4 sm:$0xff]  }
  0x81   :  { %545 = vmatpush1.bf16.msra.mxu1 %v2259_v15  ;;  %822 = vmatpush1.bf16.msra.mxu0 %v2674_v16  ;;  %v2699_v26 = vld [vmem:[#allocation9 + $0x60] ss:$16 sps:$4 sm:$0xff]   ;;  %v2702_v27 = vld [vmem:[#allocation9 + $0x84] ss:$16 sps:$4 sm:$0xff]   ;;  %v2723_v34 = vld [vmem:[#allocation9 + $0x28] ss:$16 sps:$4 sm:$0xff]  }
  0x82   :  { %583 = vmatprep.subr.bf16.mxu1 %v2263_v19  ;;  %823 = vmatprep.subr.bf16.mxu0 %v2683_v21  ;;  %v2707_v29 = vld [vmem:[#allocation9 + $0x80] ss:$16 sps:$4 sm:$0xff]   ;;  %v2712_v31 = vld [vmem:[#allocation9 + $0xa4] ss:$16 sps:$4 sm:$0xff]   ;;  %v2729_v36 = vld [vmem:[#allocation9 + $0x4c] ss:$16 sps:$4 sm:$0xff]  }
  0x83   :  { %v2719_v33 = vld [vmem:[#allocation9 + $0xa0] ss:$16 sps:$4 sm:$0xff]   ;;  %v2727_v35 = vld [vmem:[#allocation9 + $0xc4] ss:$16 sps:$4 sm:$0xff]   ;;  %v2736_v38 = vld [vmem:[#allocation9 + $0x48] ss:$16 sps:$4 sm:$0xff]  }
  0x84   :  { %2137 = vmatmul.mubr.msk.bf16.vlgmr.msra.gmra.mrb[0].mxu1 %vm538_vm0, %v467_v20  ;;  %v2734_v37 = vld [vmem:[#allocation9 + $0xc0] ss:$16 sps:$4 sm:$0xff]   ;;  %v2740_v39 = vld [vmem:[#allocation9 + $0xe4] ss:$16 sps:$4 sm:$0xff]   ;;  %v2742_v40 = vld [vmem:[#allocation9 + $0x6c] ss:$16 sps:$4 sm:$0xff]  }
  0x85   :  { %584 = vmatpush1.bf16.msra.mxu1 %v2261_v18  ;;  %824 = vmatpush1.bf16.msra.mxu0 %v2686_v22  ;;  %v2744_v41 = vld [vmem:[#allocation9 + $0xe0] ss:$16 sps:$4 sm:$0xff]   ;;  %v2746_v42 = vld [vmem:[#allocation9 + $0x68] ss:$16 sps:$4 sm:$0xff]   ;;  %v2751_v44 = vld [vmem:[#allocation9 + $0x8c] ss:$16 sps:$4 sm:$0xff]  }
  0x86   :  { %585 = vmatprep.subr.bf16.mxu1 %v2269_v23  ;;  %825 = vmatprep.subr.bf16.mxu0 %v2692_v24  ;;  %v656_v43 = vld [vmem:[%s3147_s5] sm:$0x1]  ;;  %v2757_v45 = vld [vmem:[#allocation9 + $0x88] ss:$16 sps:$4 sm:$0xff]   ;;  %v2762_v47 = vld [vmem:[#allocation9 + $0xac] ss:$16 sps:$4 sm:$0xff]  }
  0x87   :  { %615 = vmatprep.mubr.bf16.mxu1 %v2559_v8  ;;  %v658_v46 = vpack.c.bf16 %v656_v43, %v656_v43  ;;  %v2766_v48 = vld [vmem:[#allocation9 + $0xa8] ss:$16 sps:$4 sm:$0xff]   ;;  %v2770_v49 = vld [vmem:[#allocation9 + $0xcc] ss:$16 sps:$4 sm:$0xff]   ;;  %v480_v63 = vsub.s32 0, %v479_v61  ;;  %v484_v1 = vsub.s32 1, %v479_v61 }
  0x88   :  { %v2775_v50 = vld [vmem:[#allocation9 + $0xc8] ss:$16 sps:$4 sm:$0xff]   ;;  %v2779_v51 = vld [vmem:[#allocation9 + $0xec] ss:$16 sps:$4 sm:$0xff]   ;;  %v476_v0 = vld [vmem:[%s3146_s4] sm:$0xf] }
  0x89   :  { %586 = vmatpush1.bf16.msra.mxu1 %v2267_v25  ;;  %826 = vmatpush1.bf16.msra.mxu0 %v2699_v26  ;;  %v2783_v52 = vld [vmem:[#allocation9 + $0xe8] ss:$16 sps:$4 sm:$0xff]   ;;  %v481_v2 = vrot.slane %v476_v0, %v480_v63  ;;  %v485_v3 = vrot.slane %v476_v0, %v484_v1  ;;  %v488_v19 = vsub.s32 2, %v479_v61  ;;  %vm2561_vm1 = vmmov 0   ;;  %s2562_s23 = smov [#allocation10]  }
  0x8a   :  { %827 = vmatprep.subr.bf16.mxu0 %v2702_v27  ;;  %860 = vmatprep.subr.bf16.mxu1 %v2704_v28  ;;  %s1962_s24 = sshll.u32 %s2562_s23, 4  ;;  %s1963_s24 = int_to_ptr.vmem [resolvable:$true] %s1962_s24 }
  0x8b   :  { %v489_v23 = vrot.slane %v476_v0, %v488_v19  ;;  %s2511_s25 = scalar_lea.vmem %s1963_s24, 128  ;;  %p2516_p0 = scmp.lt.s32.totalorder %s1963_s24, %s1963_s24 }
  0x8c   :  { %2138 = vmatmul.mubr.msk.bf16.vlgmr.msra.gmra.mrb[4].mxu1 %vm538_vm0, %v467_v20  ;;  %v492_v20 = vsub.s32 3, %v479_v61  ;;  %p2512_p13 = scmp.ne.s32.totalorder %s1963_s24, %s2511_s25  ;;  %p2517_p1 = scmp.lt.s32.totalorder %s2511_s25, %s2511_s25 }
  0x8d   :  { %828 = vmatpush1.bf16.msra.mxu0 %v2707_v29  ;;  %861 = vmatpush1.bf16.msra.mxu1 %v2709_v30 }
  0x8e   :  { %829 = vmatprep.subr.bf16.mxu0 %v2712_v31  ;;  %862 = vmatprep.subr.bf16.mxu1 %v2716_v32  ;;  %v493_v25 = vrot.slane %v476_v0, %v492_v20  ;;  %p2518_p2 = por %p2517_p1, %p2516_p0 }
  0x8f   :  { %892 = vmatprep.mubr.bf16.mxu1 %v2559_v8 }
  0x90   :  { %p2519_p3 = pnand %p2518_p2, %p2512_p13 }
  0x91   :  { %830 = vmatpush1.bf16.msra.mxu0 %v2719_v33  ;;  %863 = vmatpush1.bf16.msra.mxu1 %v2723_v34 }
  0x92   :  { %831 = vmatprep.subr.bf16.mxu0 %v2727_v35  ;;  %864 = vmatprep.subr.bf16.mxu1 %v2729_v36 }
  0x95   :  { %832 = vmatpush1.bf16.msra.mxu0 %v2734_v37  ;;  %865 = vmatpush1.bf16.msra.mxu1 %v2736_v38 }
  0x96   :  { %833 = vmatprep.subr.bf16.mxu0 %v2740_v39  ;;  %866 = vmatprep.subr.bf16.mxu1 %v2742_v40 }
  0x99   :  { %834 = vmatpush1.bf16.msra.mxu0 %v2744_v41  ;;  %867 = vmatpush1.bf16.msra.mxu1 %v2746_v42 }
  0x9a   :  { %868 = vmatprep.subr.bf16.mxu1 %v2751_v44  ;;  %931 = vmatprep.subr.bf16.mxu0 %v2657_v10 }
  0x9c   :  { %852 = vmatmul.mubr.bf16.vlgmr.msra.gmra.mrb[0].mxu0 %v658_v46 }
  0x9d   :  { %869 = vmatpush1.bf16.msra.mxu1 %v2757_v45  ;;  %932 = vmatpush1.bf16.msra.mxu0 %v2662_v12 }
  0x9e   :  { %870 = vmatprep.subr.bf16.mxu1 %v2762_v47  ;;  %933 = vmatprep.subr.bf16.mxu0 %v2669_v14 }
  0x9f   :  { %963 = vmatprep.mubr.bf16.mxu0 %v2559_v8 }
  0xa1   :  { %871 = vmatpush1.bf16.msra.mxu1 %v2766_v48  ;;  %934 = vmatpush1.bf16.msra.mxu0 %v2674_v16 }
  0xa2   :  { %872 = vmatprep.subr.bf16.mxu1 %v2770_v49  ;;  %935 = vmatprep.subr.bf16.mxu0 %v2683_v21 }
  0xa5   :  { %873 = vmatpush1.bf16.msra.mxu1 %v2775_v50  ;;  %936 = vmatpush1.bf16.msra.mxu0 %v2686_v22 }
  0xa6   :  { %874 = vmatprep.subr.bf16.mxu1 %v2779_v51  ;;  %937 = vmatprep.subr.bf16.mxu0 %v2692_v24 }
  0xa9   :  { %875 = vmatpush1.bf16.msra.mxu1 %v2783_v52  ;;  %938 = vmatpush1.bf16.msra.mxu0 %v2699_v26 }
  0xaa   :  { %972 = vmatprep.subr.bf16.mxu1 %v2704_v28  ;;  %939 = vmatprep.subr.bf16.mxu0 %v2702_v27 }
  0xac   :  { %893 = vmatmul.mubr.bf16.vlgmr.msra.gmra.mrb[8].mxu1 %v658_v46 }
  0xad   :  { %973 = vmatpush1.bf16.msra.mxu1 %v2709_v30  ;;  %940 = vmatpush1.bf16.msra.mxu0 %v2707_v29 }
  0xae   :  { %974 = vmatprep.subr.bf16.mxu1 %v2716_v32  ;;  %941 = vmatprep.subr.bf16.mxu0 %v2712_v31 }
  0xaf   :  { %1004 = vmatprep.mubr.bf16.mxu1 %v2559_v8 }
  0xb1   :  { %975 = vmatpush1.bf16.msra.mxu1 %v2723_v34  ;;  %942 = vmatpush1.bf16.msra.mxu0 %v2719_v33 }
  0xb2   :  { %976 = vmatprep.subr.bf16.mxu1 %v2729_v36  ;;  %943 = vmatprep.subr.bf16.mxu0 %v2727_v35 }
  0xb5   :  { %977 = vmatpush1.bf16.msra.mxu1 %v2736_v38  ;;  %944 = vmatpush1.bf16.msra.mxu0 %v2734_v37 }
  0xb6   :  { %978 = vmatprep.subr.bf16.mxu1 %v2742_v40  ;;  %945 = vmatprep.subr.bf16.mxu0 %v2740_v39 }
  0xb9   :  { %979 = vmatpush1.bf16.msra.mxu1 %v2746_v42  ;;  %946 = vmatpush1.bf16.msra.mxu0 %v2744_v41 }
  0xba   :  { %980 = vmatprep.subr.bf16.mxu1 %v2751_v44  ;;  %1062 = vmatprep.subr.bf16.mxu0 %v2657_v10 }
  0xbd   :  { %981 = vmatpush1.bf16.msra.mxu1 %v2757_v45 }
  0xbe   :  { %982 = vmatprep.subr.bf16.mxu1 %v2762_v47 }
  0xc1   :  { %983 = vmatpush1.bf16.msra.mxu1 %v2766_v48 }
  0xc2   :  { %984 = vmatprep.subr.bf16.mxu1 %v2770_v49 }
  0xc5   :  { %985 = vmatpush1.bf16.msra.mxu1 %v2775_v50 }
  0xc6   :  { %986 = vmatprep.subr.bf16.mxu1 %v2779_v51 }
  0xc9   :  { %987 = vmatpush1.bf16.msra.mxu1 %v2783_v52 }
  0xca   :  { %1103 = vmatprep.subr.bf16.mxu1 %v2704_v28 }
 0x157   :  { %v576_v53 = vpop.f32.mrb[0].mxu1 }
 0x158   :  { %v578_v54 = vpop.f32.mrb[1].mxu1  ;;  %v2820_v4 = vadd.f32 %v576_v53, %v481_v2 }
 0x159   :  { %v580_v55 = vpop.f32.mrb[2].mxu1  ;;  %v2822_v5 = vadd.f32 %v578_v54, %v485_v3 }
 0x15a   :  { %v581_v56 = vpop.f32.mrb[3].mxu1 }
 0x15f   :  { %v617_v58 = vpop.f32.mrb[4].mxu1 }
 0x160   :  { %v619_v59 = vpop.f32.mrb[5].mxu1  ;;  %v2826_v46 = vadd.f32 %v617_v58, %v489_v23  ;;  %v657_v58 = vld [vmem:[%s3148_s6] sm:$0x1] }
 0x161   :  { %v621_v60 = vpop.f32.mrb[6].mxu1  ;;  %v2828_v54 = vadd.f32 %v619_v59, %v493_v25 }
 0x162   :  { %v622_v62 = vpop.f32.mrb[7].mxu1 }
 0x16f   :  { %v853_v6 = vpop.f32.mrb[0].mxu0 }
 0x170   :  { %v901_v7 = vadd.f32 %v853_v6, %v2820_v4  ;;  %v855_v9 = vpop.f32.mrb[1].mxu0 }
 0x171   :  { %v902_v11 = vadd.f32 %v855_v9, %v2822_v5  ;;  %v857_v13 = vpop.f32.mrb[2].mxu0 }
 0x172   :  { %v2171_v15 = vmul.f32 -1.442695, %v901_v7  ;;  %v858_v17 = vpop.f32.mrb[3].mxu0 }
 0x173   :  { %v2172_v18 = vmul.f32 -1.442695, %v902_v11 }
 0x174   :  { %2317 = vpow2.f32 %v2171_v15 }
 0x175   :  { %2319 = vpow2.f32 %v2172_v18 }
 0x17e   :  { %v2318_v43 = vpop.eup %2317 }
 0x17f   :  { %v2320_v53 = vpop.eup %2319  ;;  %v914_v55 = vadd.f32 1.0, %v2318_v43  ;;  %v894_v56 = vpop.f32.mrb[8].mxu1 }
 0x180   :  { %v915_v57 = vadd.f32 1.0, %v2320_v53  ;;  %v903_v60 = vadd.f32 %v894_v56, %v2826_v46  ;;  %v896_v62 = vpop.f32.mrb[9].mxu1 }
 0x181   :  { %2321 = vrcp.f32 %v914_v55  ;;  %v904_v63 = vadd.f32 %v896_v62, %v2828_v54  ;;  %v898_v1 = vpop.f32.mrb[10].mxu1 }
 0x182   :  { %2323 = vrcp.f32 %v915_v57  ;;  %v899_v61 = vpop.f32.mrb[11].mxu1 }
 0x183   :  { %2325 = vtanh.f32 %v903_v60  ;;  %v2173_v0 = vmul.f32 -1.442695, %v904_v63 }
 0x185   :  { %2327 = vpow2.f32 %v2173_v0 }
 0x18b   :  { %v2322_v59 = vpop.eup %2321 }
 0x18c   :  { %v2324_v2 = vpop.eup %2323 }
 0x18d   :  { %v2326_v3 = vpop.eup %2325  ;;  %v924_v6 = vmul.f32 %v2324_v2, %v657_v58 }
 0x18e   :  { %v925_v7 = vmul.f32 %v2326_v3, %v2322_v59 }
 0x18f   :  { %v2328_v9 = vpop.eup %2327 }
 0x190   :  { %v2835_v11 = vadd.f32 %v925_v7, %v924_v6  ;;  %v916_v13 = vadd.f32 1.0, %v2328_v9 }
 0x192   :  { %2329 = vtanh.f32 %v2835_v11 }
 0x193   :  { %2331 = vrcp.f32 %v916_v13 }
 0x19c   :  { %v2330_v15 = vpop.eup %2329 }
 0x19d   :  { %v2332_v17 = vpop.eup %2331 }
 0x19e   :  { %v928_v18 = vmul.f32 %v2332_v17, %v2330_v15 }
 0x1a0   :  { %929 = vst [vmem:[#allocation3] sm:$0x1] %v928_v18  ;;  %v930_v19 = vpack.c.bf16 %v928_v18, %v928_v18 }
 0x1a2   :  { %964 = vmatmul.mubr.bf16.vlgmr.msra.gmra.mrb[4].mxu0 %v930_v19  ;;  %1005 = vmatmul.mubr.bf16.vlgmr.msra.gmra.mrb[12].mxu1 %v930_v19 }
 0x1a3   :  { %1063 = vmatpush1.bf16.msra.mxu0 %v2662_v12  ;;  %1104 = vmatpush1.bf16.msra.mxu1 %v2709_v30 }
 0x1a4   :  { %1064 = vmatprep.subr.bf16.mxu0 %v2669_v14  ;;  %1105 = vmatprep.subr.bf16.mxu1 %v2716_v32 }
 0x1a5   :  { %1094 = vmatprep.mubr.bf16.mxu0 %v2559_v8  ;;  %1135 = vmatprep.mubr.bf16.mxu1 %v2559_v8 }
 0x1a7   :  { %1065 = vmatpush1.bf16.msra.mxu0 %v2674_v16  ;;  %1106 = vmatpush1.bf16.msra.mxu1 %v2723_v34 }
 0x1a8   :  { %1066 = vmatprep.subr.bf16.mxu0 %v2683_v21  ;;  %1107 = vmatprep.subr.bf16.mxu1 %v2729_v36 }
 0x1ab   :  { %1067 = vmatpush1.bf16.msra.mxu0 %v2686_v22  ;;  %1108 = vmatpush1.bf16.msra.mxu1 %v2736_v38 }
 0x1ac   :  { %1068 = vmatprep.subr.bf16.mxu0 %v2692_v24  ;;  %1109 = vmatprep.subr.bf16.mxu1 %v2742_v40 }
 0x1af   :  { %1069 = vmatpush1.bf16.msra.mxu0 %v2699_v26  ;;  %1110 = vmatpush1.bf16.msra.mxu1 %v2746_v42 }
 0x1b0   :  { %1070 = vmatprep.subr.bf16.mxu0 %v2702_v27  ;;  %1111 = vmatprep.subr.bf16.mxu1 %v2751_v44 }
 0x1b3   :  { %1071 = vmatpush1.bf16.msra.mxu0 %v2707_v29  ;;  %1112 = vmatpush1.bf16.msra.mxu1 %v2757_v45 }
 0x1b4   :  { %1072 = vmatprep.subr.bf16.mxu0 %v2712_v31  ;;  %1113 = vmatprep.subr.bf16.mxu1 %v2762_v47 }
 0x1b7   :  { %1073 = vmatpush1.bf16.msra.mxu0 %v2719_v33  ;;  %1114 = vmatpush1.bf16.msra.mxu1 %v2766_v48 }
 0x1b8   :  { %1074 = vmatprep.subr.bf16.mxu0 %v2727_v35  ;;  %1115 = vmatprep.subr.bf16.mxu1 %v2770_v49 }
 0x1bb   :  { %1075 = vmatpush1.bf16.msra.mxu0 %v2734_v37  ;;  %1116 = vmatpush1.bf16.msra.mxu1 %v2775_v50 }
 0x1bc   :  { %1076 = vmatprep.subr.bf16.mxu0 %v2740_v39  ;;  %1117 = vmatprep.subr.bf16.mxu1 %v2779_v51 }
 0x1bf   :  { %1077 = vmatpush1.bf16.msra.mxu0 %v2744_v41  ;;  %1118 = vmatpush1.bf16.msra.mxu1 %v2783_v52 }
 0x1c0   :  { %1192 = vmatprep.subr.bf16.mxu0 %v2657_v10  ;;  %1233 = vmatprep.subr.bf16.mxu1 %v2704_v28 }
 0x275   :  { %v965_v20 = vpop.f32.mrb[4].mxu0  ;;  %v1006_v23 = vpop.f32.mrb[12].mxu1 }
 0x276   :  { %v1017_v25 = vrot.slane %v965_v20, 7  ;;  %v967_v43 = vpop.f32.mrb[5].mxu0  ;;  %v1008_v53 = vpop.f32.mrb[13].mxu1  ;;  %v1019_v2 = vrot.slane %v1006_v23, 7  ;;  %v1049_v20 = vrot.slane %v2835_v11, 7 }
 0x277   :  { %v1018_v55 = vrot.slane %v967_v43, 7  ;;  %v969_v56 = vpop.f32.mrb[6].mxu0  ;;  %v1010_v57 = vpop.f32.mrb[14].mxu1  ;;  %v1020_v58 = vrot.slane %v1008_v53, 7 }
 0x278   :  { %v1025_v60 = vadd.f32 %v1017_v25, %v2820_v4  ;;  %v970_v62 = vpop.f32.mrb[7].mxu0  ;;  %v1011_v63 = vpop.f32.mrb[15].mxu1  ;;  %v1027_v6 = vadd.f32 %v1019_v2, %v2826_v46 }
 0x279   :  { %v1026_v1 = vadd.f32 %v1018_v55, %v2822_v5  ;;  %v1028_v59 = vadd.f32 %v1020_v58, %v2828_v54 }
 0x27a   :  { %v2174_v61 = vmul.f32 -1.442695, %v1025_v60 }
 0x27b   :  { %v2175_v0 = vmul.f32 -1.442695, %v1026_v1  ;;  %v2176_v3 = vmul.f32 -1.442695, %v1028_v59 }
 0x27c   :  { %2333 = vpow2.f32 %v2174_v61 }
 0x27d   :  { %2335 = vpow2.f32 %v2175_v0 }
 0x27e   :  { %2337 = vpow2.f32 %v2176_v3 }
 0x27f   :  { %2339 = vtanh.f32 %v1027_v6 }
 0x286   :  { %v2334_v7 = vpop.eup %2333 }
 0x287   :  { %v2336_v9 = vpop.eup %2335  ;;  %v1038_v13 = vadd.f32 1.0, %v2334_v7 }
 0x288   :  { %v1039_v15 = vadd.f32 1.0, %v2336_v9  ;;  %v2338_v17 = vpop.eup %2337 }
 0x289   :  { %2341 = vrcp.f32 %v1038_v13  ;;  %v2340_v18 = vpop.eup %2339  ;;  %v1040_v53 = vadd.f32 1.0, %v2338_v17 }
 0x28a   :  { %2343 = vrcp.f32 %v1039_v15 }
 0x28b   :  { %2345 = vrcp.f32 %v1040_v53 }
 0x293   :  { %v2342_v19 = vpop.eup %2341 }
 0x294   :  { %v2344_v25 = vpop.eup %2343  ;;  %v1052_v43 = vmul.f32 %v2342_v19, %v2340_v18 }
 0x295   :  { %v1051_v23 = vmul.f32 %v2344_v25, %v1049_v20  ;;  %v2346_v56 = vpop.eup %2345 }
 0x297   :  { %v2877_v55 = vadd.f32 %v1052_v43, %v1051_v23 }
 0x299   :  { %2347 = vtanh.f32 %v2877_v55 }
 0x2a3   :  { %v2348_v57 = vpop.eup %2347 }
 0x2a4   :  { %v1055_v60 = vmul.f32 %v2348_v57, %v2346_v56 }
 0x2a6   :  { %1056 = vst [vmem:[#allocation3] sm:$0x2] %v1055_v60  ;;  %v1057_v62 = vpack.c.bf16 %v1055_v60, %v1055_v60 }
 0x2a8   :  { %v1059_v63 = vshrl.u32 %v1057_v62, 16 }
 0x2aa   :  { %1095 = vmatmul.mubr.bf16.vlgmr.msra.gmra.mrb[8].mxu0 %v1059_v63  ;;  %1136 = vmatmul.mubr.bf16.vlgmr.msra.gmra.mrb[16].mxu1 %v1059_v63 }
 0x2ab   :  { %1193 = vmatpush1.bf16.msra.mxu0 %v2662_v12  ;;  %1234 = vmatpush1.bf16.msra.mxu1 %v2709_v30 }
 0x2ac   :  { %1194 = vmatprep.subr.bf16.mxu0 %v2669_v14  ;;  %1235 = vmatprep.subr.bf16.mxu1 %v2716_v32 }
 0x2ad   :  { %1224 = vmatprep.mubr.bf16.mxu0 %v2559_v8  ;;  %1265 = vmatprep.mubr.bf16.mxu1 %v2559_v8 }
 0x2af   :  { %1195 = vmatpush1.bf16.msra.mxu0 %v2674_v16  ;;  %1236 = vmatpush1.bf16.msra.mxu1 %v2723_v34 }
 0x2b0   :  { %1196 = vmatprep.subr.bf16.mxu0 %v2683_v21  ;;  %1237 = vmatprep.subr.bf16.mxu1 %v2729_v36 }
 0x2b3   :  { %1197 = vmatpush1.bf16.msra.mxu0 %v2686_v22  ;;  %1238 = vmatpush1.bf16.msra.mxu1 %v2736_v38 }
 0x2b4   :  { %1198 = vmatprep.subr.bf16.mxu0 %v2692_v24  ;;  %1239 = vmatprep.subr.bf16.mxu1 %v2742_v40 }
 0x2b7   :  { %1199 = vmatpush1.bf16.msra.mxu0 %v2699_v26  ;;  %1240 = vmatpush1.bf16.msra.mxu1 %v2746_v42 }
 0x2b8   :  { %1200 = vmatprep.subr.bf16.mxu0 %v2702_v27  ;;  %1241 = vmatprep.subr.bf16.mxu1 %v2751_v44 }
 0x2bb   :  { %1201 = vmatpush1.bf16.msra.mxu0 %v2707_v29  ;;  %1242 = vmatpush1.bf16.msra.mxu1 %v2757_v45 }
 0x2bc   :  { %1202 = vmatprep.subr.bf16.mxu0 %v2712_v31  ;;  %1243 = vmatprep.subr.bf16.mxu1 %v2762_v47 }
 0x2bf   :  { %1203 = vmatpush1.bf16.msra.mxu0 %v2719_v33  ;;  %1244 = vmatpush1.bf16.msra.mxu1 %v2766_v48 }
 0x2c0   :  { %1204 = vmatprep.subr.bf16.mxu0 %v2727_v35  ;;  %1245 = vmatprep.subr.bf16.mxu1 %v2770_v49 }
 0x2c3   :  { %1205 = vmatpush1.bf16.msra.mxu0 %v2734_v37  ;;  %1246 = vmatpush1.bf16.msra.mxu1 %v2775_v50 }
 0x2c4   :  { %1206 = vmatprep.subr.bf16.mxu0 %v2740_v39  ;;  %1247 = vmatprep.subr.bf16.mxu1 %v2779_v51 }
 0x2c7   :  { %1207 = vmatpush1.bf16.msra.mxu0 %v2744_v41  ;;  %1248 = vmatpush1.bf16.msra.mxu1 %v2783_v52 }
 0x2c8   :  { %1324 = vmatprep.subr.bf16.mxu0 %v2657_v10  ;;  %1365 = vmatprep.subr.bf16.mxu1 %v2704_v28 }
 0x37d   :  { %v1096_v11 = vpop.f32.mrb[8].mxu0  ;;  %v1137_v1 = vpop.f32.mrb[16].mxu1 }
 0x37e   :  { %v1148_v61 = vrot.slane %v1096_v11, 6  ;;  %v1098_v0 = vpop.f32.mrb[9].mxu0  ;;  %v1139_v58 = vpop.f32.mrb[17].mxu1  ;;  %v1150_v20 = vrot.slane %v1137_v1, 6  ;;  %v1180_v11 = vrot.slane %v2877_v55, 7 }
 0x37f   :  { %v1149_v59 = vrot.slane %v1098_v0, 6  ;;  %v1100_v2 = vpop.f32.mrb[10].mxu0  ;;  %v1141_v3 = vpop.f32.mrb[18].mxu1  ;;  %v1151_v18 = vrot.slane %v1139_v58, 6 }
 0x380   :  { %v1156_v6 = vadd.f32 %v1148_v61, %v2820_v4  ;;  %v1101_v7 = vpop.f32.mrb[11].mxu0  ;;  %v1142_v9 = vpop.f32.mrb[19].mxu1  ;;  %v1158_v43 = vadd.f32 %v1150_v20, %v2826_v46 }
 0x381   :  { %v1157_v13 = vadd.f32 %v1149_v59, %v2822_v5  ;;  %v1159_v19 = vadd.f32 %v1151_v18, %v2828_v54 }
 0x382   :  { %v2177_v15 = vmul.f32 -1.442695, %v1156_v6 }
 0x383   :  { %v2178_v17 = vmul.f32 -1.442695, %v1157_v13  ;;  %v2179_v25 = vmul.f32 -1.442695, %v1159_v19 }
 0x384   :  { %2349 = vpow2.f32 %v2177_v15 }
 0x385   :  { %2351 = vpow2.f32 %v2178_v17 }
 0x386   :  { %2353 = vpow2.f32 %v2179_v25 }
 0x387   :  { %2355 = vtanh.f32 %v1158_v43 }
 0x38e   :  { %v2350_v53 = vpop.eup %2349 }
 0x38f   :  { %v2352_v23 = vpop.eup %2351  ;;  %v1169_v56 = vadd.f32 1.0, %v2350_v53 }
 0x390   :  { %v1170_v57 = vadd.f32 1.0, %v2352_v23  ;;  %v2354_v60 = vpop.eup %2353 }
 0x391   :  { %2357 = vrcp.f32 %v1169_v56  ;;  %v2356_v62 = vpop.eup %2355  ;;  %v1171_v58 = vadd.f32 1.0, %v2354_v60 }
 0x392   :  { %2359 = vrcp.f32 %v1170_v57 }
 0x393   :  { %2361 = vrcp.f32 %v1171_v58 }
 0x39b   :  { %v2358_v63 = vpop.eup %2357 }
 0x39c   :  { %v2360_v61 = vpop.eup %2359  ;;  %v1183_v0 = vmul.f32 %v2358_v63, %v2356_v62 }
 0x39d   :  { %v1182_v1 = vmul.f32 %v2360_v61, %v1180_v11  ;;  %v2362_v2 = vpop.eup %2361 }
 0x39f   :  { %v2919_v59 = vadd.f32 %v1183_v0, %v1182_v1 }
 0x3a1   :  { %2363 = vtanh.f32 %v2919_v59 }
 0x3ab   :  { %v2364_v3 = vpop.eup %2363 }
 0x3ac   :  { %v1186_v6 = vmul.f32 %v2364_v3, %v2362_v2 }
 0x3ae   :  { %1187 = vst [vmem:[#allocation3] sm:$0x4] %v1186_v6  ;;  %v1188_v7 = vpack.c.bf16 %v1186_v6, %v1186_v6 }
 0x3b0   :  { %v1190_v9 = vrot.slane %v1188_v7, 1 }
 0x3b2   :  { %1225 = vmatmul.mubr.bf16.vlgmr.msra.gmra.mrb[12].mxu0 %v1190_v9  ;;  %1266 = vmatmul.mubr.bf16.vlgmr.msra.gmra.mrb[20].mxu1 %v1190_v9  ;;  %v1310_v9 = vrot.slane %v2919_v59, 7 }
 0x3b3   :  { %1325 = vmatpush1.bf16.msra.mxu0 %v2662_v12  ;;  %1366 = vmatpush1.bf16.msra.mxu1 %v2709_v30 }
 0x3b4   :  { %1326 = vmatprep.subr.bf16.mxu0 %v2669_v14  ;;  %1367 = vmatprep.subr.bf16.mxu1 %v2716_v32 }
 0x3b5   :  { %1356 = vmatprep.mubr.bf16.mxu0 %v2559_v8  ;;  %1397 = vmatprep.mubr.bf16.mxu1 %v2559_v8 }
 0x3b7   :  { %1327 = vmatpush1.bf16.msra.mxu0 %v2674_v16  ;;  %1368 = vmatpush1.bf16.msra.mxu1 %v2723_v34 }
 0x3b8   :  { %1328 = vmatprep.subr.bf16.mxu0 %v2683_v21  ;;  %1369 = vmatprep.subr.bf16.mxu1 %v2729_v36 }
 0x3bb   :  { %1329 = vmatpush1.bf16.msra.mxu0 %v2686_v22  ;;  %1370 = vmatpush1.bf16.msra.mxu1 %v2736_v38 }
 0x3bc   :  { %1330 = vmatprep.subr.bf16.mxu0 %v2692_v24  ;;  %1371 = vmatprep.subr.bf16.mxu1 %v2742_v40 }
 0x3bf   :  { %1331 = vmatpush1.bf16.msra.mxu0 %v2699_v26  ;;  %1372 = vmatpush1.bf16.msra.mxu1 %v2746_v42 }
 0x3c0   :  { %1332 = vmatprep.subr.bf16.mxu0 %v2702_v27  ;;  %1373 = vmatprep.subr.bf16.mxu1 %v2751_v44 }
 0x3c3   :  { %1333 = vmatpush1.bf16.msra.mxu0 %v2707_v29  ;;  %1374 = vmatpush1.bf16.msra.mxu1 %v2757_v45 }
 0x3c4   :  { %1334 = vmatprep.subr.bf16.mxu0 %v2712_v31  ;;  %1375 = vmatprep.subr.bf16.mxu1 %v2762_v47 }
 0x3c7   :  { %1335 = vmatpush1.bf16.msra.mxu0 %v2719_v33  ;;  %1376 = vmatpush1.bf16.msra.mxu1 %v2766_v48 }
 0x3c8   :  { %1336 = vmatprep.subr.bf16.mxu0 %v2727_v35  ;;  %1377 = vmatprep.subr.bf16.mxu1 %v2770_v49 }
 0x3cb   :  { %1337 = vmatpush1.bf16.msra.mxu0 %v2734_v37  ;;  %1378 = vmatpush1.bf16.msra.mxu1 %v2775_v50 }
 0x3cc   :  { %1338 = vmatprep.subr.bf16.mxu0 %v2740_v39  ;;  %1379 = vmatprep.subr.bf16.mxu1 %v2779_v51 }
 0x3cf   :  { %1339 = vmatpush1.bf16.msra.mxu0 %v2744_v41  ;;  %1380 = vmatpush1.bf16.msra.mxu1 %v2783_v52 }
 0x3d0   :  { %1454 = vmatprep.subr.bf16.mxu0 %v2657_v10  ;;  %1495 = vmatprep.subr.bf16.mxu1 %v2704_v28 }
 0x485   :  { %v1226_v55 = vpop.f32.mrb[12].mxu0  ;;  %v1267_v13 = vpop.f32.mrb[20].mxu1 }
 0x486   :  { %v1278_v15 = vrot.slane %v1226_v55, 5  ;;  %v1228_v17 = vpop.f32.mrb[13].mxu0  ;;  %v1269_v18 = vpop.f32.mrb[21].mxu1  ;;  %v1280_v63 = vrot.slane %v1267_v13, 5 }
 0x487   :  { %v1279_v19 = vrot.slane %v1228_v17, 5  ;;  %v1230_v20 = vpop.f32.mrb[14].mxu0  ;;  %v1271_v25 = vpop.f32.mrb[22].mxu1  ;;  %v1281_v62 = vrot.slane %v1269_v18, 5 }
 0x488   :  { %v1286_v43 = vadd.f32 %v1278_v15, %v2820_v4  ;;  %v1231_v53 = vpop.f32.mrb[15].mxu0  ;;  %v1272_v23 = vpop.f32.mrb[23].mxu1  ;;  %v1288_v61 = vadd.f32 %v1280_v63, %v2826_v46 }
 0x489   :  { %v1287_v56 = vadd.f32 %v1279_v19, %v2822_v5  ;;  %v1289_v10 = vadd.f32 %v1281_v62, %v2828_v54 }
 0x48a   :  { %v2180_v57 = vmul.f32 -1.442695, %v1286_v43 }
 0x48b   :  { %v2181_v60 = vmul.f32 -1.442695, %v1287_v56  ;;  %v2182_v11 = vmul.f32 -1.442695, %v1289_v10 }
 0x48c   :  { %2365 = vpow2.f32 %v2180_v57 }
 0x48d   :  { %2367 = vpow2.f32 %v2181_v60 }
 0x48e   :  { %2369 = vpow2.f32 %v2182_v11 }
 0x48f   :  { %2371 = vtanh.f32 %v1288_v61 }
 0x496   :  { %v2366_v0 = vpop.eup %2365 }
 0x497   :  { %v2368_v58 = vpop.eup %2367  ;;  %v1299_v1 = vadd.f32 1.0, %v2366_v0 }
 0x498   :  { %v1300_v2 = vadd.f32 1.0, %v2368_v58  ;;  %v2370_v3 = vpop.eup %2369 }
 0x499   :  { %2373 = vrcp.f32 %v1299_v1  ;;  %v2372_v6 = vpop.eup %2371  ;;  %v1301_v17 = vadd.f32 1.0, %v2370_v3 }
 0x49a   :  { %2375 = vrcp.f32 %v1300_v2 }
 0x49b   :  { %2377 = vrcp.f32 %v1301_v17 }
 0x4a3   :  { %v2374_v7 = vpop.eup %2373 }
 0x4a4   :  { %v2376_v55 = vpop.eup %2375  ;;  %v1313_v15 = vmul.f32 %v2374_v7, %v2372_v6 }
 0x4a5   :  { %v1312_v13 = vmul.f32 %v2376_v55, %v1310_v9  ;;  %v2378_v19 = vpop.eup %2377 }
 0x4a7   :  { %v2961_v18 = vadd.f32 %v1313_v15, %v1312_v13 }
 0x4a9   :  { %2379 = vtanh.f32 %v2961_v18  ;;  %v1442_v3 = vrot.slane %v2961_v18, 7  ;;  %v3011_v18 = vld [vmem:[#allocation9 + $0x8] ss:$16 sps:$4 sm:$0xff]  }
 0x4b3   :  { %v2380_v20 = vpop.eup %2379 }
 0x4b4   :  { %v1316_v25 = vmul.f32 %v2380_v20, %v2378_v19 }
 0x4b6   :  { %1317 = vst [vmem:[#allocation3] sm:$0x8] %v1316_v25  ;;  %v1318_v43 = vpack.c.bf16 %v1316_v25, %v1316_v25 }
 0x4b8   :  { %v1320_v53 = vshrl.u32 %v1318_v43, 16  ;;  %v3008_v43 = vld [vmem:[#allocation9] ss:$16 sps:$4 sm:$0xff]  }
 0x4ba   :  { %v1322_v23 = vrot.slane %v1320_v53, 1  ;;  %v3014_v53 = vld [vmem:[#allocation9 + $0x24] ss:$16 sps:$4 sm:$0xff]  }
 0x4bc   :  { %1357 = vmatmul.mubr.bf16.vlgmr.msra.gmra.mrb[16].mxu0 %v1322_v23  ;;  %1398 = vmatmul.mubr.bf16.vlgmr.msra.gmra.mrb[24].mxu1 %v1322_v23  ;;  %v3020_v23 = vld [vmem:[#allocation9 + $0x20] ss:$16 sps:$4 sm:$0xff]  }
 0x4bd   :  { %1455 = vmatpush1.bf16.msra.mxu0 %v2662_v12  ;;  %1496 = vmatpush1.bf16.msra.mxu1 %v2709_v30  ;;  %v2996_v12 = vld [vmem:[#allocation9 + $0x4] ss:$16 sps:$4 sm:$0xff]  }
 0x4be   :  { %1456 = vmatprep.subr.bf16.mxu0 %v2669_v14  ;;  %1497 = vmatprep.subr.bf16.mxu1 %v2716_v32 }
 0x4bf   :  { %1486 = vmatprep.mubr.bf16.mxu0 %v2559_v8  ;;  %1527 = vmatprep.mubr.bf16.mxu1 %v2559_v8 }
 0x4c1   :  { %1457 = vmatpush1.bf16.msra.mxu0 %v2674_v16  ;;  %1498 = vmatpush1.bf16.msra.mxu1 %v2723_v34 }
 0x4c2   :  { %1458 = vmatprep.subr.bf16.mxu0 %v2683_v21  ;;  %1499 = vmatprep.subr.bf16.mxu1 %v2729_v36 }
 0x4c5   :  { %1459 = vmatpush1.bf16.msra.mxu0 %v2686_v22  ;;  %1500 = vmatpush1.bf16.msra.mxu1 %v2736_v38 }
 0x4c6   :  { %1460 = vmatprep.subr.bf16.mxu0 %v2692_v24  ;;  %1501 = vmatprep.subr.bf16.mxu1 %v2742_v40 }
 0x4c9   :  { %1461 = vmatpush1.bf16.msra.mxu0 %v2699_v26  ;;  %1502 = vmatpush1.bf16.msra.mxu1 %v2746_v42 }
 0x4ca   :  { %1462 = vmatprep.subr.bf16.mxu0 %v2702_v27  ;;  %1503 = vmatprep.subr.bf16.mxu1 %v2751_v44 }
 0x4cd   :  { %1463 = vmatpush1.bf16.msra.mxu0 %v2707_v29  ;;  %1504 = vmatpush1.bf16.msra.mxu1 %v2757_v45 }
 0x4ce   :  { %1464 = vmatprep.subr.bf16.mxu0 %v2712_v31  ;;  %1505 = vmatprep.subr.bf16.mxu1 %v2762_v47 }
 0x4d1   :  { %1465 = vmatpush1.bf16.msra.mxu0 %v2719_v33  ;;  %1506 = vmatpush1.bf16.msra.mxu1 %v2766_v48 }
 0x4d2   :  { %1466 = vmatprep.subr.bf16.mxu0 %v2727_v35  ;;  %1507 = vmatprep.subr.bf16.mxu1 %v2770_v49 }
 0x4d5   :  { %1467 = vmatpush1.bf16.msra.mxu0 %v2734_v37  ;;  %1508 = vmatpush1.bf16.msra.mxu1 %v2775_v50 }
 0x4d6   :  { %1468 = vmatprep.subr.bf16.mxu0 %v2740_v39  ;;  %1509 = vmatprep.subr.bf16.mxu1 %v2779_v51 }
 0x4d9   :  { %1469 = vmatpush1.bf16.msra.mxu0 %v2744_v41  ;;  %1510 = vmatpush1.bf16.msra.mxu1 %v2783_v52 }
 0x4da   :  { %1586 = vmatprep.subr.bf16.mxu0 %v2996_v12  ;;  %1627 = vmatprep.subr.bf16.mxu1 %v2704_v28 }
 0x58f   :  { %v1358_v14 = vpop.f32.mrb[16].mxu0  ;;  %v1399_v16 = vpop.f32.mrb[24].mxu1 }
 0x590   :  { %v1410_v21 = vrot.slane %v1358_v14, 4  ;;  %v1360_v22 = vpop.f32.mrb[17].mxu0  ;;  %v1401_v24 = vpop.f32.mrb[25].mxu1  ;;  %v1412_v60 = vrot.slane %v1399_v16, 4  ;;  %v3024_v14 = vld [vmem:[#allocation9 + $0x44] ss:$16 sps:$4 sm:$0xff]  }
 0x591   :  { %v1411_v26 = vrot.slane %v1360_v22, 4  ;;  %v1362_v27 = vpop.f32.mrb[18].mxu0  ;;  %v1403_v29 = vpop.f32.mrb[26].mxu1  ;;  %v1413_v57 = vrot.slane %v1401_v24, 4  ;;  %v3028_v16 = vld [vmem:[#allocation9 + $0x40] ss:$16 sps:$4 sm:$0xff]  }
 0x592   :  { %v1418_v30 = vadd.f32 %v1410_v21, %v2820_v4  ;;  %v1363_v31 = vpop.f32.mrb[19].mxu0  ;;  %v1404_v33 = vpop.f32.mrb[27].mxu1  ;;  %v1420_v10 = vadd.f32 %v1412_v60, %v2826_v46  ;;  %v3036_v21 = vld [vmem:[#allocation9 + $0x60] ss:$16 sps:$4 sm:$0xff]  }
 0x593   :  { %v1419_v35 = vadd.f32 %v1411_v26, %v2822_v5  ;;  %v1421_v28 = vadd.f32 %v1413_v57, %v2828_v54 }
 0x594   :  { %v2183_v59 = vmul.f32 -1.442695, %v1418_v30 }
 0x595   :  { %v2184_v56 = vmul.f32 -1.442695, %v1419_v35  ;;  %v2185_v62 = vmul.f32 -1.442695, %v1421_v28 }
 0x596   :  { %2381 = vpow2.f32 %v2183_v59 }
 0x597   :  { %2383 = vpow2.f32 %v2184_v56 }
 0x598   :  { %2385 = vpow2.f32 %v2185_v62 }
 0x599   :  { %2387 = vtanh.f32 %v1420_v10 }
 0x5a0   :  { %v2382_v63 = vpop.eup %2381 }
 0x5a1   :  { %v2384_v11 = vpop.eup %2383  ;;  %v1431_v61 = vadd.f32 1.0, %v2382_v63 }
 0x5a2   :  { %v1432_v0 = vadd.f32 1.0, %v2384_v11  ;;  %v2386_v58 = vpop.eup %2385 }
 0x5a3   :  { %2389 = vrcp.f32 %v1431_v61  ;;  %v2388_v1 = vpop.eup %2387  ;;  %v1433_v9 = vadd.f32 1.0, %v2386_v58 }
 0x5a4   :  { %2391 = vrcp.f32 %v1432_v0 }
 0x5a5   :  { %2393 = vrcp.f32 %v1433_v9 }
 0x5ad   :  { %v2390_v2 = vpop.eup %2389 }
 0x5ae   :  { %v2392_v6 = vpop.eup %2391  ;;  %v1445_v7 = vmul.f32 %v2390_v2, %v2388_v1 }
 0x5af   :  { %v1444_v55 = vmul.f32 %v2392_v6, %v1442_v3  ;;  %v2394_v17 = vpop.eup %2393 }
 0x5b1   :  { %v3005_v15 = vadd.f32 %v1445_v7, %v1444_v55  ;;  %v2460_v55 = vld [vmem:[#allocation9 + $0x2c] ss:$16 sps:$4 sm:$0xff]  }
 0x5b3   :  { %2395 = vtanh.f32 %v3005_v15  ;;  %v1572_v10 = vrot.slane %v3005_v15, 7  ;;  %v2461_v15 = vld [vmem:[#allocation9 + $0x28] ss:$16 sps:$4 sm:$0xff]  }
 0x5bd   :  { %v2396_v13 = vpop.eup %2395 }
 0x5be   :  { %v1448_v19 = vmul.f32 %v2396_v13, %v2394_v17  ;;  %v2462_v17 = vld [vmem:[#allocation9 + $0x4c] ss:$16 sps:$4 sm:$0xff]   ;;  %v2463_v13 = vld [vmem:[#allocation9 + $0x48] ss:$16 sps:$4 sm:$0xff]  }
 0x5c0   :  { %1449 = vst [vmem:[#allocation3] sm:$0x10] %v1448_v19  ;;  %v1450_v20 = vpack.c.bf16 %v1448_v19, %v1448_v19  ;;  %v2464_v19 = vld [vmem:[#allocation9 + $0x6c] ss:$16 sps:$4 sm:$0xff]  }
 0x5c2   :  { %v1452_v25 = vrot.slane %v1450_v20, 2  ;;  %v2465_v20 = vld [vmem:[#allocation9 + $0x68] ss:$16 sps:$4 sm:$0xff]  }
 0x5c4   :  { %1487 = vmatmul.mubr.bf16.vlgmr.msra.gmra.mrb[20].mxu0 %v1452_v25  ;;  %1528 = vmatmul.mubr.bf16.vlgmr.msra.gmra.mrb[28].mxu1 %v1452_v25  ;;  %v2467_v25 = vld [vmem:[#allocation9 + $0x88] ss:$16 sps:$4 sm:$0xff]  }
 0x5c5   :  { %1587 = vmatpush1.bf16.msra.mxu0 %v3008_v43  ;;  %1628 = vmatpush1.bf16.msra.mxu1 %v3011_v18 }
 0x5c6   :  { %1588 = vmatprep.subr.bf16.mxu0 %v3014_v53  ;;  %1629 = vmatprep.subr.bf16.mxu1 %v2716_v32  ;;  %v3032_v32 = vld [vmem:[#allocation9 + $0x64] ss:$16 sps:$4 sm:$0xff]  }
 0x5c7   :  { %1618 = vmatprep.mubr.bf16.mxu0 %v2559_v8  ;;  %1659 = vmatprep.mubr.bf16.mxu1 %v2559_v8 }
 0x5c9   :  { %1589 = vmatpush1.bf16.msra.mxu0 %v3020_v23  ;;  %1630 = vmatpush1.bf16.msra.mxu1 %v2723_v34  ;;  %v3040_v34 = vld [vmem:[#allocation9 + $0x84] ss:$16 sps:$4 sm:$0xff]  }
 0x5ca   :  { %1590 = vmatprep.subr.bf16.mxu0 %v3024_v14  ;;  %1631 = vmatprep.subr.bf16.mxu1 %v2729_v36  ;;  %v3044_v36 = vld [vmem:[#allocation9 + $0x80] ss:$16 sps:$4 sm:$0xff]  }
 0x5cd   :  { %1591 = vmatpush1.bf16.msra.mxu0 %v3028_v16  ;;  %1632 = vmatpush1.bf16.msra.mxu1 %v2736_v38  ;;  %v3048_v38 = vld [vmem:[#allocation9 + $0xa4] ss:$16 sps:$4 sm:$0xff]  }
 0x5ce   :  { %1592 = vmatprep.subr.bf16.mxu0 %v3032_v32  ;;  %1633 = vmatprep.subr.bf16.mxu1 %v2742_v40  ;;  %v3052_v40 = vld [vmem:[#allocation9 + $0xa0] ss:$16 sps:$4 sm:$0xff]  }
 0x5d1   :  { %1593 = vmatpush1.bf16.msra.mxu0 %v3036_v21  ;;  %1634 = vmatpush1.bf16.msra.mxu1 %v2746_v42  ;;  %v3056_v42 = vld [vmem:[#allocation9 + $0xc4] ss:$16 sps:$4 sm:$0xff]  }
 0x5d2   :  { %1594 = vmatprep.subr.bf16.mxu0 %v3040_v34  ;;  %1635 = vmatprep.subr.bf16.mxu1 %v2751_v44  ;;  %v2459_v44 = vld [vmem:[#allocation9 + $0xc] ss:$16 sps:$4 sm:$0xff]  }
 0x5d5   :  { %1595 = vmatpush1.bf16.msra.mxu0 %v3044_v36  ;;  %1636 = vmatpush1.bf16.msra.mxu1 %v2757_v45 }
 0x5d6   :  { %1596 = vmatprep.subr.bf16.mxu0 %v3048_v38  ;;  %1637 = vmatprep.subr.bf16.mxu1 %v2762_v47 }
 0x5d9   :  { %1597 = vmatpush1.bf16.msra.mxu0 %v3052_v40  ;;  %1638 = vmatpush1.bf16.msra.mxu1 %v2766_v48 }
 0x5da   :  { %1598 = vmatprep.subr.bf16.mxu0 %v3056_v42  ;;  %1639 = vmatprep.subr.bf16.mxu1 %v2770_v49 }
 0x5dd   :  { %1599 = vmatpush1.bf16.msra.mxu0 %v2734_v37  ;;  %1640 = vmatpush1.bf16.msra.mxu1 %v2775_v50 }
 0x5de   :  { %1600 = vmatprep.subr.bf16.mxu0 %v2740_v39  ;;  %1641 = vmatprep.subr.bf16.mxu1 %v2779_v51 }
 0x5e1   :  { %1601 = vmatpush1.bf16.msra.mxu0 %v2744_v41  ;;  %1642 = vmatpush1.bf16.msra.mxu1 %v2783_v52 }
 0x5e2   :  { %1716 = vmatprep.subr.bf16.mxu0 %v2996_v12  ;;  %1757 = vmatprep.subr.bf16.mxu1 %v2459_v44 }
 0x697   :  { %v1488_v45 = vpop.f32.mrb[20].mxu0  ;;  %v1529_v47 = vpop.f32.mrb[28].mxu1 }
 0x698   :  { %v1540_v48 = vrot.slane %v1488_v45, 3  ;;  %v1490_v49 = vpop.f32.mrb[21].mxu0  ;;  %v1531_v22 = vpop.f32.mrb[29].mxu1  ;;  %v1542_v30 = vrot.slane %v1529_v47, 3 }
 0x699   :  { %v1541_v37 = vrot.slane %v1490_v49, 3  ;;  %v1492_v24 = vpop.f32.mrb[22].mxu0  ;;  %v1533_v50 = vpop.f32.mrb[30].mxu1  ;;  %v1543_v29 = vrot.slane %v1531_v22, 3 }
 0x69a   :  { %v1548_v39 = vadd.f32 %v1540_v48, %v2820_v4  ;;  %v1493_v26 = vpop.f32.mrb[23].mxu0  ;;  %v1534_v51 = vpop.f32.mrb[31].mxu1  ;;  %v1550_v33 = vadd.f32 %v1542_v30, %v2826_v46 }
 0x69b   :  { %v1549_v41 = vadd.f32 %v1541_v37, %v2822_v5  ;;  %v1551_v12 = vadd.f32 %v1543_v29, %v2828_v54 }
 0x69c   :  { %v2186_v27 = vmul.f32 -1.442695, %v1548_v39 }
 0x69d   :  { %v2187_v52 = vmul.f32 -1.442695, %v1549_v41  ;;  %v2188_v31 = vmul.f32 -1.442695, %v1551_v12 }
 0x69e   :  { %2397 = vpow2.f32 %v2186_v27 }
 0x69f   :  { %2399 = vpow2.f32 %v2187_v52 }
 0x6a0   :  { %2401 = vpow2.f32 %v2188_v31 }
 0x6a1   :  { %2403 = vtanh.f32 %v1550_v33 }
 0x6a8   :  { %v2398_v35 = vpop.eup %2397 }
 0x6a9   :  { %v2400_v59 = vpop.eup %2399  ;;  %v1561_v56 = vadd.f32 1.0, %v2398_v35 }
 0x6aa   :  { %v1562_v57 = vadd.f32 1.0, %v2400_v59  ;;  %v2402_v28 = vpop.eup %2401 }
 0x6ab   :  { %2405 = vrcp.f32 %v1561_v56  ;;  %v2404_v60 = vpop.eup %2403  ;;  %v1563_v61 = vadd.f32 1.0, %v2402_v28 }
 0x6ac   :  { %2407 = vrcp.f32 %v1562_v57 }
 0x6ad   :  { %2409 = vrcp.f32 %v1563_v61 }
 0x6b5   :  { %v2406_v62 = vpop.eup %2405 }
 0x6b6   :  { %v2408_v63 = vpop.eup %2407  ;;  %v1575_v11 = vmul.f32 %v2406_v62, %v2404_v60 }
 0x6b7   :  { %v1574_v0 = vmul.f32 %v2408_v63, %v1572_v10  ;;  %v2410_v1 = vpop.eup %2409 }
 0x6b9   :  { %v3072_v58 = vadd.f32 %v1575_v11, %v1574_v0 }
 0x6bb   :  { %2411 = vtanh.f32 %v3072_v58  ;;  %v1704_v56 = vrot.slane %v3072_v58, 7  ;;  %v2309_v58 = vld [vmem:[%s3149_s7] sm:$0xff]  }
 0x6c5   :  { %v2412_v2 = vpop.eup %2411 }
 0x6c6   :  { %v1578_v3 = vmul.f32 %v2412_v2, %v2410_v1  ;;  %v2560_v2 = vmov 0.0  }
 0x6c8   :  { %1579 = vst [vmem:[#allocation3] sm:$0x20] %v1578_v3  ;;  %v1580_v6 = vpack.c.bf16 %v1578_v3, %v1578_v3  ;;  %v2310_v3 = vld [vmem:[%s3149_s7 + $0x8] sm:$0xff]  }
 0x6ca   :  { %v1582_v7 = vshrl.u32 %v1580_v6, 16  ;;  %v2311_v6 = vld [vmem:[%s3149_s7 + $0x10] sm:$0xff]  }
 0x6cc   :  { %v1584_v9 = vrot.slane %v1582_v7, 2  ;;  %v2312_v7 = vld [vmem:[%s3149_s7 + $0x18] sm:$0xff]  }
 0x6ce   :  { %1619 = vmatmul.mubr.bf16.vlgmr.msra.gmra.mrb[24].mxu0 %v1584_v9  ;;  %1660 = vmatmul.mubr.bf16.vlgmr.msra.gmra.mrb[32].mxu1 %v1584_v9  ;;  %v2313_v9 = vld [vmem:[%s3149_s7 + $0x20] sm:$0xff]  }
 0x6cf   :  { %1717 = vmatpush1.bf16.msra.mxu0 %v3008_v43  ;;  %1758 = vmatpush1.bf16.msra.mxu1 %v3011_v18  ;;  %v2468_v43 = vld [vmem:[#allocation9 + $0xac] ss:$16 sps:$4 sm:$0xff]   ;;  %v2469_v18 = vld [vmem:[#allocation9 + $0xa8] ss:$16 sps:$4 sm:$0xff]  }
 0x6d0   :  { %1718 = vmatprep.subr.bf16.mxu0 %v3014_v53  ;;  %1759 = vmatprep.subr.bf16.mxu1 %v2460_v55  ;;  %v2470_v53 = vld [vmem:[#allocation9 + $0xcc] ss:$16 sps:$4 sm:$0xff]  }
 0x6d1   :  { %1748 = vmatprep.mubr.bf16.mxu0 %v2559_v8  ;;  %1789 = vmatprep.mubr.bf16.mxu1 %v2559_v8  ;;  %v2466_v8 = vld [vmem:[#allocation9 + $0x8c] ss:$16 sps:$4 sm:$0xff]  }
 0x6d2   :  { %v2314_v55 = vld [vmem:[%s3149_s7 + $0x28] sm:$0xff]  }
 0x6d3   :  { %1719 = vmatpush1.bf16.msra.mxu0 %v3020_v23  ;;  %1760 = vmatpush1.bf16.msra.mxu1 %v2461_v15  ;;  %v2471_v23 = vld [vmem:[#allocation9 + $0xc0] ss:$16 sps:$4 sm:$0xff]  }
 0x6d4   :  { %1720 = vmatprep.subr.bf16.mxu0 %v3024_v14  ;;  %1761 = vmatprep.subr.bf16.mxu1 %v2462_v17  ;;  %v2472_v14 = vld [vmem:[#allocation9 + $0xc8] ss:$16 sps:$4 sm:$0xff]   ;;  %v2315_v15 = vld [vmem:[%s3149_s7 + $0x30] sm:$0xff]  }
 0x6d5   :  { %v2316_v17 = vld [vmem:[%s3149_s7 + $0x38] sm:$0xff]  }
 0x6d7   :  { %1721 = vmatpush1.bf16.msra.mxu0 %v3028_v16  ;;  %1762 = vmatpush1.bf16.msra.mxu1 %v2463_v13  ;;  %v2473_v16 = vld [vmem:[#allocation9 + $0xe4] ss:$16 sps:$4 sm:$0xff]  }
 0x6d8   :  { %1722 = vmatprep.subr.bf16.mxu0 %v3032_v32  ;;  %1763 = vmatprep.subr.bf16.mxu1 %v2464_v19  ;;  %v2474_v32 = vld [vmem:[#allocation9 + $0xec] ss:$16 sps:$4 sm:$0xff]  }
 0x6db   :  { %1723 = vmatpush1.bf16.msra.mxu0 %v3036_v21  ;;  %1764 = vmatpush1.bf16.msra.mxu1 %v2465_v20  ;;  %v2475_v21 = vld [vmem:[#allocation9 + $0xe0] ss:$16 sps:$4 sm:$0xff]  }
 0x6dc   :  { %1724 = vmatprep.subr.bf16.mxu0 %v3040_v34  ;;  %1765 = vmatprep.subr.bf16.mxu1 %v2466_v8  ;;  %v2476_v34 = vld [vmem:[#allocation9 + $0xe8] ss:$16 sps:$4 sm:$0xff]  }
 0x6df   :  { %1725 = vmatpush1.bf16.msra.mxu0 %v3044_v36  ;;  %1766 = vmatpush1.bf16.msra.mxu1 %v2467_v25 }
 0x6e0   :  { %1726 = vmatprep.subr.bf16.mxu0 %v3048_v38  ;;  %1767 = vmatprep.subr.bf16.mxu1 %v2468_v43 }
 0x6e3   :  { %1727 = vmatpush1.bf16.msra.mxu0 %v3052_v40  ;;  %1768 = vmatpush1.bf16.msra.mxu1 %v2469_v18 }
 0x6e4   :  { %1728 = vmatprep.subr.bf16.mxu0 %v3056_v42  ;;  %1769 = vmatprep.subr.bf16.mxu1 %v2470_v53 }
 0x6e7   :  { %1729 = vmatpush1.bf16.msra.mxu0 %v2471_v23  ;;  %1770 = vmatpush1.bf16.msra.mxu1 %v2472_v14 }
 0x6e8   :  { %1730 = vmatprep.subr.bf16.mxu0 %v2473_v16  ;;  %1771 = vmatprep.subr.bf16.mxu1 %v2474_v32 }
 0x6eb   :  { %1731 = vmatpush1.bf16.msra.mxu0 %v2475_v21  ;;  %1772 = vmatpush1.bf16.msra.mxu1 %v2476_v34 }
 0x6ec   :  { %2221 = vmatprep.subr.bf16.mxu0 %v2560_v2 }
 0x7a1   :  { %v1620_v36 = vpop.f32.mrb[24].mxu0  ;;  %v1661_v38 = vpop.f32.mrb[32].mxu1 }
 0x7a2   :  { %v1672_v40 = vrot.slane %v1620_v36, 2  ;;  %v1622_v44 = vpop.f32.mrb[25].mxu0  ;;  %v1663_v45 = vpop.f32.mrb[33].mxu1  ;;  %v1674_v41 = vrot.slane %v1661_v38, 2 }
 0x7a3   :  { %v1673_v42 = vrot.slane %v1622_v44, 2  ;;  %v1624_v47 = vpop.f32.mrb[26].mxu0  ;;  %v1665_v48 = vpop.f32.mrb[34].mxu1  ;;  %v1675_v26 = vrot.slane %v1663_v45, 2 }
 0x7a4   :  { %v1680_v49 = vadd.f32 %v1672_v40, %v2820_v4  ;;  %v1625_v22 = vpop.f32.mrb[27].mxu0  ;;  %v1666_v37 = vpop.f32.mrb[35].mxu1  ;;  %v1682_v52 = vadd.f32 %v1674_v41, %v2826_v46 }
 0x7a5   :  { %v1681_v24 = vadd.f32 %v1673_v42, %v2822_v5  ;;  %v1683_v51 = vadd.f32 %v1675_v26, %v2828_v54 }
 0x7a6   :  { %v2189_v50 = vmul.f32 -1.442695, %v1680_v49 }
 0x7a7   :  { %v2190_v39 = vmul.f32 -1.442695, %v1681_v24  ;;  %v2191_v27 = vmul.f32 -1.442695, %v1683_v51 }
 0x7a8   :  { %2413 = vpow2.f32 %v2189_v50 }
 0x7a9   :  { %2415 = vpow2.f32 %v2190_v39 }
 0x7aa   :  { %2417 = vpow2.f32 %v2191_v27 }
 0x7ab   :  { %2419 = vtanh.f32 %v1682_v52 }
 0x7b2   :  { %v2414_v29 = vpop.eup %2413 }
 0x7b3   :  { %v2416_v12 = vpop.eup %2415  ;;  %v1693_v30 = vadd.f32 1.0, %v2414_v29  ;;  %v2195_v29 = vld [vmem:[%s3150_s8] ss:$0 sm:$0xff] }
 0x7b4   :  { %v1694_v31 = vadd.f32 1.0, %v2416_v12  ;;  %v2418_v33 = vpop.eup %2417 }
 0x7b5   :  { %2421 = vrcp.f32 %v1693_v30  ;;  %v2420_v35 = vpop.eup %2419  ;;  %v1695_v60 = vadd.f32 1.0, %v2418_v33 }
 0x7b6   :  { %2423 = vrcp.f32 %v1694_v31 }
 0x7b7   :  { %2425 = vrcp.f32 %v1695_v60 }
 0x7bf   :  { %v2422_v59 = vpop.eup %2421 }
 0x7c0   :  { %v2424_v57 = vpop.eup %2423  ;;  %v1707_v28 = vmul.f32 %v2422_v59, %v2420_v35 }
 0x7c1   :  { %v1706_v62 = vmul.f32 %v2424_v57, %v1704_v56  ;;  %v2426_v63 = vpop.eup %2425 }
 0x7c3   :  { %v3095_v10 = vadd.f32 %v1707_v28, %v1706_v62 }
 0x7c5   :  { %2427 = vtanh.f32 %v3095_v10  ;;  %v1834_v37 = vrot.slane %v3095_v10, 7 }
 0x7cf   :  { %v2428_v11 = vpop.eup %2427 }
 0x7d0   :  { %v1710_v61 = vmul.f32 %v2428_v11, %v2426_v63 }
 0x7d2   :  { %1711 = vst [vmem:[#allocation3] sm:$0x40] %v1710_v61  ;;  %v1712_v0 = vpack.c.bf16 %v1710_v61, %v1710_v61 }
 0x7d4   :  { %v1714_v1 = vrot.slane %v1712_v0, 3 }
 0x7d6   :  { %1749 = vmatmul.mubr.bf16.vlgmr.msra.gmra.mrb[28].mxu0 %v1714_v1  ;;  %1790 = vmatmul.mubr.bf16.vlgmr.msra.gmra.mrb[36].mxu1 %v1714_v1 }
 0x7d7   :  { %2222 = vmatpush3.bf16.msra.mxu0 %v2309_v58  ;;  %2237 = vmatprep.mubr.msk.bf16.mxu0 %vm2561_vm1, %v2560_v2 }
 0x7d8   :  { %2223 = vmatprep.subr.bf16.mxu0 %v2560_v2 }
 0x7db   :  { %2224 = vmatpush3.bf16.msra.mxu0 %v2310_v3 }
 0x7dc   :  { %2225 = vmatprep.subr.bf16.mxu0 %v2560_v2 }
 0x7df   :  { %2226 = vmatpush3.bf16.msra.mxu0 %v2311_v6 }
 0x7e0   :  { %2227 = vmatprep.subr.bf16.mxu0 %v2560_v2 }
 0x7e3   :  { %2228 = vmatpush3.bf16.msra.mxu0 %v2312_v7 }
 0x7e4   :  { %2229 = vmatprep.subr.bf16.mxu0 %v2560_v2 }
 0x7e7   :  { %2230 = vmatpush3.bf16.msra.mxu0 %v2313_v9 }
 0x7e8   :  { %2231 = vmatprep.subr.bf16.mxu0 %v2560_v2 }
 0x7eb   :  { %2232 = vmatpush3.bf16.msra.mxu0 %v2314_v55 }
 0x7ec   :  { %2233 = vmatprep.subr.bf16.mxu0 %v2560_v2 }
 0x7ef   :  { %2234 = vmatpush3.bf16.msra.mxu0 %v2315_v15 }
 0x7f0   :  { %2235 = vmatprep.subr.bf16.mxu0 %v2560_v2 }
 0x7f3   :  { %2236 = vmatpush3.bf16.msra.mxu0 %v2316_v17 }
 0x8a9   :  { %v1750_v13 = vpop.f32.mrb[28].mxu0  ;;  %v1791_v19 = vpop.f32.mrb[36].mxu1 }
 0x8aa   :  { %v1802_v20 = vrot.slane %v1750_v13, 1  ;;  %v1752_v8 = vpop.f32.mrb[29].mxu0  ;;  %v1793_v25 = vpop.f32.mrb[37].mxu1  ;;  %v1804_v40 = vrot.slane %v1791_v19, 1 }
 0x8ab   :  { %v1803_v43 = vrot.slane %v1752_v8, 1  ;;  %v1754_v18 = vpop.f32.mrb[30].mxu0  ;;  %v1795_v53 = vpop.f32.mrb[38].mxu1  ;;  %v1805_v36 = vrot.slane %v1793_v25, 1 }
 0x8ac   :  { %v1810_v23 = vadd.f32 %v1802_v20, %v2820_v4  ;;  %v1755_v14 = vpop.f32.mrb[31].mxu0  ;;  %v1796_v16 = vpop.f32.mrb[39].mxu1  ;;  %v1812_v45 = vadd.f32 %v1804_v40, %v2826_v46 }
 0x8ad   :  { %v1811_v32 = vadd.f32 %v1803_v43, %v2822_v5  ;;  %v1813_v38 = vadd.f32 %v1805_v36, %v2828_v54 }
 0x8ae   :  { %v2192_v21 = vmul.f32 -1.442695, %v1810_v23 }
 0x8af   :  { %v2193_v34 = vmul.f32 -1.442695, %v1811_v32  ;;  %v2194_v44 = vmul.f32 -1.442695, %v1813_v38 }
 0x8b0   :  { %2429 = vpow2.f32 %v2192_v21 }
 0x8b1   :  { %2431 = vpow2.f32 %v2193_v34 }
 0x8b2   :  { %2433 = vpow2.f32 %v2194_v44 }
 0x8b3   :  { %2435 = vtanh.f32 %v1812_v45 }
 0x8ba   :  { %v2430_v42 = vpop.eup %2429 }
 0x8bb   :  { %v2432_v47 = vpop.eup %2431  ;;  %v1823_v48 = vadd.f32 1.0, %v2430_v42 }
 0x8bc   :  { %v1824_v4 = vadd.f32 1.0, %v2432_v47  ;;  %v2434_v5 = vpop.eup %2433 }
 0x8bd   :  { %2437 = vrcp.f32 %v1823_v48  ;;  %v2436_v49 = vpop.eup %2435  ;;  %v1825_v54 = vadd.f32 1.0, %v2434_v5 }
 0x8be   :  { %2439 = vrcp.f32 %v1824_v4 }
 0x8bf   :  { %2441 = vrcp.f32 %v1825_v54 }
 0x8c7   :  { %v2438_v22 = vpop.eup %2437 }
 0x8c8   :  { %v2440_v24 = vpop.eup %2439  ;;  %v1837_v50 = vmul.f32 %v2438_v22, %v2436_v49 }
 0x8c9   :  { %v1836_v39 = vmul.f32 %v2440_v24, %v1834_v37  ;;  %v2442_v46 = vpop.eup %2441 }
 0x8cb   :  { %v1838_v26 = vadd.f32 %v1837_v50, %v1836_v39 }
 0x8cd   :  { %2443 = vtanh.f32 %v1838_v26 }
 0x8d7   :  { %v2444_v51 = vpop.eup %2443 }
 0x8d8   :  { %v1840_v41 = vmul.f32 %v2444_v51, %v2442_v46 }
 0x8da   :  { %1841 = vst [vmem:[#allocation3] sm:$0x80] %v1840_v41 }
 0x8e1   :  { %v1842_v27 = vld [vmem:[#allocation3] sm:$0xff] }
 0x8e2   :  { %v1843_v52 = vpack.c.bf16 %v1842_v27, %v1842_v27 }
 0x8e4   :  { %2238 = vmatmul.mubr.bf16.vlgmr.msra.gmra.mrb[32].mxu0 %v1843_v52 }
 0x9b7   :  { %v1949_v12 = vpop.f32.mrb[32].mxu0 }
 0x9b8   :  { %v1950_v30 = vadd.f32 %v2195_v29, %v1949_v12  ;;  %v2239_v31 = vpop.f32.mrb[33].mxu0 }
 0x9b9   :  { %v1952_v33 = vpop.f32.mrb[34].mxu0 }
 0x9ba   :  { %1955 = vst [vmem:[#allocation10] sm:$0xff] %v1950_v30  ;;  %v2240_v35 = vpop.f32.mrb[35].mxu0 }
 0x9bb   :  { %2522 = shalt.err (!%p2519_p3)
}
 0x9bc   :  { %s2523_s8 = scalar_lea.hbm %s3151_s9, 128 }
 0x9bd   :  { %p2524_p4 = scmp.ne.s32.totalorder %s3151_s9, %s2523_s8  ;;  %p2527_p5 = scmp.lt.u32.totalorder %s2523_s8, %s3151_s9 }
 0x9bf   :  { %p2529_p6 = pnand %p2527_p5, %p2524_p4 }
 0x9c1   :  { %2532 = shalt.err (!%p2529_p6)
}
 0x9c2   :  { %1965 = dma.vmem_to_hbm [thread:$0]  %s1963_s24, 128, %s3151_s9, [#allocation7]  }
 0x9c3   :  { %2553 = dma.done.wait [#allocation7], 128  }
 0x9c4   :  { %2554 = vsyncadd [#allocation7], 4294967168 }
 0x9c5   :  { %1969 = vsyncpa [#allocation6], 1 }
 0x9c6   :  { %1970 = vsyncpa [#allocation7], 1 }
 0x9c7   :  { %1971 = vsyncpa [#allocation8], 1 }
 0x9c8   :  { %1972 = vsyncmov [#allocation4] }
 0x9cb   :  { %s1973_s6 = vpop.sfrf %1972 }
 0x9cc   :  { %p2204_p7 = scmp.ne.s32.totalorder %s1973_s6, 0 }
 0x9ce   :  { %1977 = shalt.err (%p2204_p7)  }
 0x9cf   :  { %1979 = vsyncmov [#allocation4 + $0x1] }
 0x9d2   :  { %s1980_s10 = vpop.sfrf %1979 }
 0x9d3   :  { %p2205_p8 = scmp.ne.s32.totalorder %s1980_s10, 0 }
 0x9d5   :  { %1984 = shalt.err (%p2205_p8)  }
 0x9d6   :  { %1986 = vsyncmov [#allocation4 + $0x2] }
 0x9d9   :  { %s1987_s11 = vpop.sfrf %1986 }
 0x9da   :  { %p2206_p9 = scmp.ne.s32.totalorder %s1987_s11, 0 }
 0x9dc   :  { %1991 = shalt.err (%p2206_p9)  }
 0x9dd   :  { %1993 = vsyncmov [#allocation4 + $0x3] }
 0x9e0   :  { %s1994_s12 = vpop.sfrf %1993 }
 0x9e1   :  { %p2207_p10 = scmp.ne.s32.totalorder %s1994_s12, 0 }
 0x9e3   :  { %1998 = shalt.err (%p2207_p10)  }
 0x9e4   :  { %2000 = vsyncmov [#allocation4 + $0x4] }
 0x9e7   :  { %s2001_s9 = vpop.sfrf %2000 }
 0x9e8   :  { %p2208_p11 = scmp.ne.s32.totalorder %s2001_s9, 0 }
 0x9ea   :  { %2005 = shalt.err (%p2208_p11)  }
 0x9eb   :  { %2007 = vsyncmov [#allocation4 + $0x5] }
 0x9ee   :  { %s2008_s13 = vpop.sfrf %2007 }
 0x9ef   :  { %p2209_p12 = scmp.ne.s32.totalorder %s2008_s13, 0 }
 0x9f1   :  { %2012 = shalt.err (%p2209_p12)  }
 0x9f2   :  { %2014 = vsyncmov [#allocation4 + $0x6] }
 0x9f5   :  { %s2015_s3 = vpop.sfrf %2014 }
 0x9f6   :  { %p2210_p13 = scmp.ne.s32.totalorder %s2015_s3, 0 }
 0x9f8   :  { %2019 = shalt.err (%p2210_p13)  }
 0x9f9   :  { %2021 = vsyncmov [#allocation4 + $0x7] }
 0x9fc   :  { %s2022_s1 = vpop.sfrf %2021 }
 0x9fd   :  { %p2211_p0 = scmp.ne.s32.totalorder %s2022_s1, 0 }
 0x9ff   :  { %2026 = shalt.err (%p2211_p0)  }

</bundles_post_ra>
